<compile_context>
chip_gen: v5e
topology: v5e:2x2
jax: 0.10.0
libtpu: 0.0.40
codegen_flags: <defaults>
</compile_context>

<pallas_src>
import jax
import jax.numpy as jnp
import numpy as np
from jax.experimental import pallas as pl
from jax.experimental.pallas import tpu as pltpu


# ----------------------------------------------------------------------------
# helpers
# ----------------------------------------------------------------------------
def _round_up(x, m):
    return ((x + m - 1) // m) * m


def _cdiv(a, b):
    return (a + b - 1) // b


def _pick_tile(dim, target, mult):
    """Largest tile <= target that divides dim (multiple of `mult`), else dim."""
    if dim <= target:
        return dim
    t = (target // mult) * mult
    while t >= mult:
        if dim % t == 0:
            return t
        t -= mult
    return dim  # fall back to a single block


def _tile_targets():
    """Generation-specific (tm, tn, tk, vmem_cap_bytes) targets.

    Roofline targets from the perf review:
      v5e : 512x512  (AI ~256 >= ~240 flop/byte needed)
      v6e : 1024x2048 (AI ~683 >= ~680)
      v7x : 768x1024 (AI ~439 >= ~311), VMEM capped well inside 64 MiB.
    """
    kind = ""
    try:
        kind = jax.devices()[0].device_kind.lower()
    except Exception:  # pragma: no cover - defensive
        pass
    if "v5e" in kind or "v5 lite" in kind or "v5lite" in kind:
        return 512, 512, 512, 96 << 20
    if "v7" in kind or "tpu7" in kind:
        return 768, 1024, 512, 44 << 20
    if "v6" in kind or "trillium" in kind:
        return 1024, 2048, 512, 96 << 20
    # unknown / other generations: conservative, fits a 64 MiB VMEM chip
    return 512, 1024, 512, 44 << 20


def _fused_footprint(tm, tn, tk, apply_cal, write_logits, compute_ce):
    """Approximate VMEM bytes for the fused kernel (double-buffered inputs)."""
    b = 0
    b += 2 * tm * tk * 2                       # h (bf16, double buffered)
    if apply_cal:
        b += 2 * tm * tk * 2                   # h_cal
    b += 2 * tk * tn * 2                       # W^T tile
    b += 2 * tm * 4                            # labels (int32)
    if write_logits:
        b += 2 * tm * tn * 2                   # logits out
    if compute_ce:
        b += 2 * tm * 4                        # loss out
        b += 3 * tm * 4                        # m / l / tgt scratch
    b += tm * tn * 4                           # f32 accumulator scratch
    return b


# ----------------------------------------------------------------------------
# Fused logits matmul + lm_head calibration + cross entropy
# ----------------------------------------------------------------------------
def _make_fused_kernel(tm, tn, n_j, n_k, new_start, new_end,
                       apply_cal, compute_ce, write_logits, three_d):
    # NOTE: correctness of the shared acc/m/l/tgt scratch relies on the grid
    # iteration order (i outer, j middle, k inner).  Do not reorder the grid.
    def kernel(*refs):
        p = 0
        h_ref = refs[p]; p += 1
        hcal_ref = None
        if apply_cal:
            hcal_ref = refs[p]; p += 1
        wt_ref = refs[p]; p += 1
        lab_ref = refs[p]; p += 1
        logits_ref = None
        if write_logits:
            logits_ref = refs[p]; p += 1
        loss_ref = None
        if compute_ce:
            loss_ref = refs[p]; p += 1
        acc_ref = refs[p]; p += 1
        if compute_ce:
            m_ref, l_ref, tgt_ref = refs[p], refs[p + 1], refs[p + 2]

        j = pl.program_id(1)
        k = pl.program_id(2) if three_d else None

        # absolute column indices of this V tile -- one (1, tn) iota reused by
        # both the calibration column mask and the CE target gather.
        col = j * tn + jax.lax.broadcasted_iota(jnp.int32, (1, tn), 1)

        if three_d:
            @pl.when(k == 0)
            def _():
                acc_ref[...] = jnp.zeros_like(acc_ref)

            acc_ref[...] += jnp.dot(h_ref[...], wt_ref[...],
                                    preferred_element_type=jnp.float32)
        else:
            # single K block: plain assign, no init/accumulate bookkeeping
            acc_ref[...] = jnp.dot(h_ref[...], wt_ref[...],
                                   preferred_element_type=jnp.float32)

        if apply_cal:
            # lm_head calibration via  h @ (W_row + W_row @ C.T).T
            #                        == h @ W_row.T + (h @ C) @ W_row.T
            # Only V-tiles overlapping [new_start, new_end) pay the extra
            # matmul; the column mask is applied to the (tm, tn) *result*.
            col0 = j * tn

            @pl.when(jnp.logical_and(col0 < new_end, col0 + tn > new_start))
            def _():
                delta = jnp.dot(hcal_ref[...], wt_ref[...],
                                preferred_element_type=jnp.float32)
                in_range = jnp.logical_and(col >= new_start, col < new_end)
                acc_ref[...] += jnp.where(in_range, delta, 0.0)

        def epilogue():
            logits_f32 = acc_ref[...]
            if write_logits:
                logits_ref[...] = logits_f32.astype(logits_ref.dtype)
            if compute_ce:
                # online logsumexp over the V grid axis, from the f32 acc
                @pl.when(j == 0)
                def _():
                    m_ref[...] = jnp.full_like(m_ref, -jnp.inf)
                    l_ref[...] = jnp.zeros_like(l_ref)
                    tgt_ref[...] = jnp.zeros_like(tgt_ref)

                m_prev = m_ref[...]
                m_new = jnp.maximum(
                    m_prev, jnp.max(logits_f32, axis=-1, keepdims=True))
                l_ref[...] = (l_ref[...] * jnp.exp(m_prev - m_new)
                              + jnp.sum(jnp.exp(logits_f32 - m_new),
                                        axis=-1, keepdims=True))
                m_ref[...] = m_new
                tgt_ref[...] += jnp.sum(
                    jnp.where(col == lab_ref[...], logits_f32, 0.0),
                    axis=-1, keepdims=True)

                @pl.when(j == n_j - 1)
                def _():
                    raw = m_ref[...] + jnp.log(l_ref[...]) - tgt_ref[...]
                    # padded / ignore_index (<0) labels -> zero per-token loss
                    loss_ref[...] = jnp.where(lab_ref[...] < 0, 0.0, raw)

        if three_d:
            @pl.when(k == n_k - 1)
            def _():
                epilogue()
        else:
            epilogue()

    return kernel


def fused_logits_ce(h2d, h_cal, wt, labels_flat, *, new_start, new_end,
                    apply_cal, compute_ce, write_logits=True,
                    tm=None, tn=None, tk=None):
    """logits = h @ WT (with fused lm_head calibration) and per-token CE."""
    assert write_logits or compute_ce
    N, H = h2d.shape
    Hw, V = wt.shape
    assert Hw == H

    tm_t, tn_t, tk_t, vmem_cap = _tile_targets()

    # Row tile: pad N to a multiple of tm (bf16 sublane packing -> mult 16),
    # keep >= 2 row blocks when possible so v7x megacore has work on both TCs.
    if tm is None:
        tm = min(tm_t, _round_up(N, 16))
        if N > tm and _cdiv(N, tm) < 2:
            tm = max(16, _round_up(_cdiv(N, 2), 16))
    tn = tn if tn is not None else _pick_tile(V, tn_t, 128)
    if tk is None:
        # Prefer tk == H (drop the K grid axis) whenever the footprint allows:
        # h is then DMA'd once per row block instead of V/tn times.
        if _fused_footprint(tm, tn, H, apply_cal, write_logits,
                            compute_ce) <= int(0.85 * vmem_cap):
            tk = H
        else:
            tk = _pick_tile(H, tk_t, 128)
    # shrink the V tile if the chosen combination would oversubscribe VMEM
    while (_fused_footprint(tm, tn, tk, apply_cal, write_logits, compute_ce)
           > int(0.85 * vmem_cap) and tn > 128):
        smaller = _pick_tile(V, tn // 2, 128)
        if smaller >= tn:
            break
        tn = smaller

    assert V % tn == 0 and H % tk == 0
    N_pad = _round_up(N, tm)
    if N_pad != N:
        pad = N_pad - N
        h2d = jnp.pad(h2d, ((0, pad), (0, 0)))
        if apply_cal:
            h_cal = jnp.pad(h_cal, ((0, pad), (0, 0)))
        labels_flat = jnp.pad(labels_flat, ((0, pad), (0, 0)),
                              constant_values=-1)

    n_i, n_j = N_pad // tm, V // tn
    three_d = tk < H
    n_k = H // tk if three_d else 1

    if three_d:
        grid = (n_i, n_j, n_k)
        ik = lambda i, j, k: (i, k)
        kj = lambda i, j, k: (k, j)
        ij = lambda i, j, k: (i, j)
        i0 = lambda i, j, k: (i, 0)
        sems = ("parallel", "arbitrary", "arbitrary")
    else:
        grid = (n_i, n_j)
        ik = lambda i, j: (i, 0)
        kj = lambda i, j: (0, j)
        ij = lambda i, j: (i, j)
        i0 = lambda i, j: (i, 0)
        sems = ("parallel", "arbitrary")

    in_specs = [pl.BlockSpec((tm, tk), ik)]
    inputs = [h2d]
    if apply_cal:
        in_specs.append(pl.BlockSpec((tm, tk), ik))
        inputs.append(h_cal)
    in_specs += [pl.BlockSpec((tk, tn), kj),
                 pl.BlockSpec((tm, 1), i0)]
    inputs += [wt, labels_flat]

    out_shapes, out_specs = [], []
    if write_logits:
        out_shapes.append(jax.ShapeDtypeStruct((N_pad, V), h2d.dtype))
        out_specs.append(pl.BlockSpec((tm, tn), ij))
    if compute_ce:
        out_shapes.append(jax.ShapeDtypeStruct((N_pad, 1), jnp.float32))
        out_specs.append(pl.BlockSpec((tm, 1), i0))

    scratch = [pltpu.VMEM((tm, tn), jnp.float32)]        # f32 accumulator
    if compute_ce:
        scratch += [pltpu.VMEM((tm, 1), jnp.float32),     # running max
                    pltpu.VMEM((tm, 1), jnp.float32),     # running sum
                    pltpu.VMEM((tm, 1), jnp.float32)]     # target logit

    footprint = _fused_footprint(tm, tn, tk, apply_cal, write_logits,
                                 compute_ce)
    vmem_limit = int(min(100 << 20,
                         max(32 << 20, footprint * 5 // 4 + (2 << 20))))

    cal_cols = (new_end - new_start) if apply_cal else 0
    cost = pl.CostEstimate(
        flops=2 * N_pad * H * V + 2 * N_pad * H * cal_cols,
        transcendentals=N_pad * V if compute_ce else 0,
        bytes_accessed=(N_pad * H * 2 * (2 if apply_cal else 1)
                        + H * V * 2
                        + (N_pad * V * 2 if write_logits else 0)
                        + 2 * N_pad * 4))

    kernel = _make_fused_kernel(tm, tn, n_j, n_k, new_start, new_end,
                                apply_cal, compute_ce, write_logits, three_d)

    res = pl.pallas_call(
        kernel,
        grid_spec=pltpu.PrefetchScalarGridSpec(
            num_scalar_prefetch=0, grid=grid,
            in_specs=in_specs, out_specs=out_specs,
            scratch_shapes=scratch),
        out_shape=tuple(out_shapes),
        compiler_params=pltpu.CompilerParams(
            # N is independent (megacore-parallel); V carries the online
            # softmax reduction and H the matmul reduction -> "arbitrary".
            dimension_semantics=sems,
            vmem_limit_bytes=vmem_limit),
        cost_estimate=cost,
    )(*inputs)
    if not isinstance(res, (tuple, list)):
        res = (res,)

    pos = 0
    logits = per_loss = None
    if write_logits:
        logits = res[pos]; pos += 1
    if compute_ce:
        per_loss = res[pos]
    if N_pad != N:
        if logits is not None:
            logits = logits[:N]
        if per_loss is not None:
            per_loss = per_loss[:N]
    return logits, per_loss


# ----------------------------------------------------------------------------
# Post-gather embedding calibration:  x += (ids >= new_start) * (x @ C.T)
# (contraction-tiled so the (H,H) calibrator never needs one giant block)
# ----------------------------------------------------------------------------
def _make_embed_cal_kernel(new_start, n_k):
    def kernel(xk_ref, ids_ref, w_ref, xo_ref, o_ref, acc_ref):
        k = pl.program_id(2)

        @pl.when(k == 0)
        def _():
            acc_ref[...] = jnp.zeros_like(acc_ref)

        # delta[:, j-block] += x[:, k-block] @ W[j-block, k-block].T
        acc_ref[...] += jax.lax.dot_general(
            xk_ref[...], w_ref[...], (((1,), (1,)), ((), ())),
            preferred_element_type=jnp.float32)

        @pl.when(k == n_k - 1)
        def _():
            is_new = ids_ref[...] >= new_start            # [tm, 1]
            o_ref[...] = (xo_ref[...].astype(jnp.float32)
                          + jnp.where(is_new, acc_ref[...], 0.0)
                          ).astype(o_ref.dtype)
    return kernel


def calibrate_gathered_embeddings(x, ids, w, *, new_start,
                                  tm=None, th=None, tkc=None):
    N, H = x.shape
    tm = tm if tm is not None else min(256, _round_up(N, 16))
    th = th if th is not None else _pick_tile(H, 512, 128)
    tkc = tkc if tkc is not None else _pick_tile(H, 512, 128)
    N_pad = _round_up(N, tm)
    if N_pad != N:
        x = jnp.pad(x, ((0, N_pad - N), (0, 0)))
        ids = jnp.pad(ids, ((0, N_pad - N), (0, 0)))
    n_k = H // tkc
    out = pl.pallas_call(
        _make_embed_cal_kernel(new_start, n_k),
        grid=(N_pad // tm, H // th, n_k),
        in_specs=[pl.BlockSpec((tm, tkc), lambda i, j, k: (i, k)),   # x (matmul)
                  pl.BlockSpec((tm, 1), lambda i, j, k: (i, 0)),     # ids
                  pl.BlockSpec((th, tkc), lambda i, j, k: (j, k)),   # calibrator
                  pl.BlockSpec((tm, th), lambda i, j, k: (i, j))],   # x (add)
        out_specs=pl.BlockSpec((tm, th), lambda i, j, k: (i, j)),
        out_shape=jax.ShapeDtypeStruct((N_pad, H), x.dtype),
        scratch_shapes=[pltpu.VMEM((tm, th), jnp.float32)],
        compiler_params=pltpu.CompilerParams(
            dimension_semantics=("parallel", "parallel", "arbitrary")),
    )(x, ids, w, x)
    return out[:N] if N_pad != N else out


# ----------------------------------------------------------------------------
# Small tiled NN matmul over rows:  x[N,H] @ w[H,K]   (h_cal = h @ calW)
# ----------------------------------------------------------------------------
def _make_rows_matmul_kernel(n_k):
    def kernel(x_ref, w_ref, o_ref, acc_ref):
        k = pl.program_id(2)

        @pl.when(k == 0)
        def _():
            acc_ref[...] = jnp.zeros_like(acc_ref)

        acc_ref[...] += jnp.dot(x_ref[...], w_ref[...],
                                preferred_element_type=jnp.float32)

        @pl.when(k == n_k - 1)
        def _():
            o_ref[...] = acc_ref[...].astype(o_ref.dtype)
    return kernel


def rows_nn_matmul(x, w, *, tm=None, tn=None, tkc=None):
    N, H = x.shape
    Hw, K = w.shape
    assert Hw == H
    tm = tm if tm is not None else min(256, _round_up(N, 16))
    tn = tn if tn is not None else _pick_tile(K, 512, 128)
    tkc = tkc if tkc is not None else _pick_tile(H, 512, 128)
    N_pad = _round_up(N, tm)
    if N_pad != N:
        x = jnp.pad(x, ((0, N_pad - N), (0, 0)))
    n_k = H // tkc
    out = pl.pallas_call(
        _make_rows_matmul_kernel(n_k),
        grid=(N_pad // tm, K // tn, n_k),
        in_specs=[pl.BlockSpec((tm, tkc), lambda i, j, k: (i, k)),
                  pl.BlockSpec((tkc, tn), lambda i, j, k: (k, j))],
        out_specs=pl.BlockSpec((tm, tn), lambda i, j, k: (i, j)),
        out_shape=jax.ShapeDtypeStruct((N_pad, K), x.dtype),
        scratch_shapes=[pltpu.VMEM((tm, tn), jnp.float32)],
        compiler_params=pltpu.CompilerParams(
            dimension_semantics=("parallel", "parallel", "arbitrary")),
    )(x, w)
    # TODO(synk): h_cal stays bf16 (matches the bf16 PyTorch calibrator); an
    # f32 h_cal would avoid one extra rounding step at higher DMA cost.
    return out[:N] if N_pad != N else out


# ----------------------------------------------------------------------------
# calibrate_logits=True path: fused gamma-scaling + online-softmax CE
# (+ optional scaled-logits write), replacing 3 XLA passes over [N, V].
# ----------------------------------------------------------------------------
def _make_scale_ce_kernel(tm, tn, n_j, new_start, write_logits):
    def kernel(*refs):
        p = 0
        lg_ref = refs[p]; p += 1
        g_ref = refs[p]; p += 1
        lab_ref = refs[p]; p += 1
        out_ref = None
        if write_logits:
            out_ref = refs[p]; p += 1
        loss_ref = refs[p]; p += 1
        m_ref, l_ref, tgt_ref = refs[p], refs[p + 1], refs[p + 2]

        j = pl.program_id(1)
        col = j * tn + jax.lax.broadcasted_iota(jnp.int32, (1, tn), 1)

        lg = lg_ref[...].astype(jnp.float32)
        lg = jnp.where(col >= new_start, lg * g_ref[...], lg)
        if write_logits:
            out_ref[...] = lg.astype(out_ref.dtype)

        @pl.when(j == 0)
        def _():
            m_ref[...] = jnp.full_like(m_ref, -jnp.inf)
            l_ref[...] = jnp.zeros_like(l_ref)
            tgt_ref[...] = jnp.zeros_like(tgt_ref)

        m_prev = m_ref[...]
        m_new = jnp.maximum(m_prev, jnp.max(lg, axis=-1, keepdims=True))
        l_ref[...] = (l_ref[...] * jnp.exp(m_prev - m_new)
                      + jnp.sum(jnp.exp(lg - m_new), axis=-1, keepdims=True))
        m_ref[...] = m_new
        tgt_ref[...] += jnp.sum(jnp.where(col == lab_ref[...], lg, 0.0),
                                axis=-1, keepdims=True)

        @pl.when(j == n_j - 1)
        def _():
            raw = m_ref[...] + jnp.log(l_ref[...]) - tgt_ref[...]
            loss_ref[...] = jnp.where(lab_ref[...] < 0, 0.0, raw)

    return kernel


def scale_logits_and_ce(logits2d, gamma, labels_flat, *, new_start,
                        write_logits=True, tm=None, tn=None):
    N, V = logits2d.shape
    tm_t, tn_t, _, _ = _tile_targets()
    tm = tm if tm is not None else min(tm_t, _round_up(N, 16))
    tn = tn if tn is not None else _pick_tile(V, tn_t, 128)
    N_pad = _round_up(N, tm)
    if N_pad != N:
        pad = N_pad - N
        logits2d = jnp.pad(logits2d, ((0, pad), (0, 0)))
        gamma = jnp.pad(gamma, ((0, pad), (0, 0)))
        labels_flat = jnp.pad(labels_flat, ((0, pad), (0, 0)),
                              constant_values=-1)
    assert V % tn == 0
    n_i, n_j = N_pad // tm, V // tn

    out_shapes, out_specs = [], []
    if write_logits:
        out_shapes.append(jax.ShapeDtypeStruct((N_pad, V), logits2d.dtype))
        out_specs.append(pl.BlockSpec((tm, tn), lambda i, j: (i, j)))
    out_shapes.append(jax.ShapeDtypeStruct((N_pad, 1), jnp.float32))
    out_specs.append(pl.BlockSpec((tm, 1), lambda i, j: (i, 0)))

    res = pl.pallas_call(
        _make_scale_ce_kernel(tm, tn, n_j, new_start, write_logits),
        grid_spec=pltpu.PrefetchScalarGridSpec(
            num_scalar_prefetch=0, grid=(n_i, n_j),
            in_specs=[pl.BlockSpec((tm, tn), lambda i, j: (i, j)),
                      pl.BlockSpec((tm, 1), lambda i, j: (i, 0)),
                      pl.BlockSpec((tm, 1), lambda i, j: (i, 0))],
            out_specs=out_specs,
            scratch_shapes=[pltpu.VMEM((tm, 1), jnp.float32),
                            pltpu.VMEM((tm, 1), jnp.float32),
                            pltpu.VMEM((tm, 1), jnp.float32)]),
        out_shape=tuple(out_shapes),
        compiler_params=pltpu.CompilerParams(
            dimension_semantics=("parallel", "arbitrary")),
    )(logits2d, gamma, labels_flat)
    if not isinstance(res, (tuple, list)):
        res = (res,)

    pos = 0
    scaled = None
    if write_logits:
        scaled = res[pos]; pos += 1
    loss = res[pos]
    if N_pad != N:
        if scaled is not None:
            scaled = scaled[:N]
        loss = loss[:N]
    return scaled, loss


# ----------------------------------------------------------------------------
# Weighted masked loss — tiny [B,T] reduction, kept in plain XLA per review.
# NOTE: mirrors the PyTorch semantics: labels < start (including ignore_index
# -100) count in the "original" group denominator, but their per-token loss is
# zero (CrossEntropyLoss(reduction='none') with default ignore_index).
# ----------------------------------------------------------------------------
def weighted_masked_loss(per_loss, labels, new_tokens_start,
                         orig_alpha=0.6, subseq_alpha=0.3, new_alpha=0.1):
    orig = labels < new_tokens_start
    new = jnp.logical_not(orig)
    subseq = jnp.concatenate(
        [jnp.zeros_like(new[:, :1]), new[:, :-1]], axis=1)

    def mmean(mask):
        m = mask.astype(jnp.float32)
        cnt = jnp.sum(m)
        # empty-group guard (PyTorch .mean() on an empty mask would be NaN)
        return jnp.where(cnt > 0,
                         jnp.sum(per_loss * m) / jnp.maximum(cnt, 1.0), 0.0)

    return (orig_alpha * mmean(orig)
            + new_alpha * mmean(new)
            + subseq_alpha * mmean(subseq))


# ----------------------------------------------------------------------------
# Synthetic base model (stand-in for the external HF transformer)
# ----------------------------------------------------------------------------
def synthetic_base_model(params, inputs_embeds, attention_mask):
    # TODO(synk): the arbitrary HF `base_model` transformer is external to this
    # module; replaced by a deterministic single-layer tanh MLP producing
    # `last_hidden_state` of the same shape/dtype.
    del attention_mask
    h = jnp.tanh(jnp.dot(inputs_embeds.astype(jnp.float32),
                         params["base_W"].astype(jnp.float32)))
    return h.astype(inputs_embeds.dtype)


# ----------------------------------------------------------------------------
# ModifiedModel.forward
# ----------------------------------------------------------------------------
def modified_model_forward(params, input_ids, labels, attention_mask=None, *,
                           new_tokens_start, new_tokens_end,
                           calibrate_lm_head=True, calibrate_embedding=True,
                           calibrate_logits=False, return_logits=True,
                           tm=None, tn=None, tk=None):
    labels = labels[:, 1:]
    input_ids = input_ids[:, :-1]
    B, T = input_ids.shape
    N = B * T

    E = params["embed_W"]        # (V, H) bf16 embedding table
    WT = params["lm_head_WT"]    # (H, V) bf16: lm_head weight, pre-transposed

    # gather first, calibrate per-token afterwards (no full-table copy)
    # TODO(synk): the gather + calibration could be fused into one
    # scalar-prefetch kernel to avoid one (N,H) HBM round trip.
    ids_flat = input_ids.reshape(N, 1).astype(jnp.int32)
    embeds = jnp.take(E, input_ids.reshape(-1), axis=0)          # (N, H) glue
    if calibrate_embedding:
        embeds = calibrate_gathered_embeddings(
            embeds, ids_flat, params["embedding_calibrator_W"],
            new_start=new_tokens_start)
        if attention_mask is None:
            attention_mask = jnp.ones_like(input_ids, dtype=jnp.int32)
    inputs_embeds = embeds.reshape(B, T, -1)

    hidden = synthetic_base_model(params, inputs_embeds, attention_mask)
    h2d = hidden.reshape(N, -1)

    # h_cal = h @ calW  (so the lm_head calibration fuses into the logits
    # matmul; no [V,H] weight copy)
    h_cal = (rows_nn_matmul(h2d, params["unembedding_calibrator_W"])
             if calibrate_lm_head else None)

    labels_flat = labels.reshape(N, 1).astype(jnp.int32)

    want_logits_out = return_logits or calibrate_logits
    logits2d, per_loss = fused_logits_ce(
        h2d, h_cal, WT, labels_flat,
        new_start=new_tokens_start, new_end=new_tokens_end,
        apply_cal=calibrate_lm_head,
        compute_ce=not calibrate_logits,
        write_logits=want_logits_out,
        tm=tm, tn=tn, tk=tk)

    if calibrate_logits:
        # gamma from the un-scaled logits (one HBM read), then one fused Pallas
        # pass that scales, writes the scaled logits and computes the CE.
        w_g = params["logits_calibrator_W"]                      # (1, V)
        gamma = jnp.dot(logits2d, w_g.T,
                        preferred_element_type=jnp.float32)      # (N, 1) f32
        logits2d, per_loss = scale_logits_and_ce(
            logits2d, gamma, labels_flat, new_start=new_tokens_start,
            write_logits=return_logits, tm=tm, tn=tn)

    per_loss = per_loss.reshape(B, T)
    loss = weighted_masked_loss(per_loss, labels, new_tokens_start)

    logits_out = (logits2d.reshape(B, T, -1)
                  if (return_logits and logits2d is not None) else None)
    return {"loss": loss, "logits": logits_out}


# ----------------------------------------------------------------------------
# Pure-JAX f32 reference (mirrors the PyTorch math) for a loose check
# ----------------------------------------------------------------------------
def _reference_forward(params, input_ids, labels, *, new_start, new_end,
                       calibrate_logits=False):
    f32 = jnp.float32
    ids = input_ids[:, :-1]
    labs = labels[:, 1:]
    E = params["embed_W"].astype(f32)
    W = params["lm_head_WT"].astype(f32).T                      # (V, H)
    calE = params["embedding_calibrator_W"].astype(f32)
    calU = params["unembedding_calibrator_W"].astype(f32)
    E_used = E.at[new_start:].set(E[new_start:] + E[new_start:] @ calE.T)
    x = E_used[ids]
    h = jnp.tanh(x @ params["base_W"].astype(f32))
    Wn = W.at[new_start:new_end].set(
        W[new_start:new_end] + W[new_start:new_end] @ calU.T)
    logits = h @ Wn.T
    if calibrate_logits:
        gamma = logits @ params["logits_calibrator_W"].astype(f32).T
        col = jnp.arange(logits.shape[-1])
        logits = jnp.where(col >= new_start, logits * gamma, logits)
    lse = jax.nn.logsumexp(logits, axis=-1)
    tgt = jnp.take_along_axis(logits, labs[..., None], axis=-1)[..., 0]
    per_loss = lse - tgt
    orig = labs < new_start
    new = jnp.logical_not(orig)
    sub = jnp.concatenate([jnp.zeros_like(new[:, :1]), new[:, :-1]], axis=1)

    def mmean(m):
        mf = m.astype(f32)
        c = jnp.sum(mf)
        return jnp.where(c > 0, jnp.sum(per_loss * mf) / jnp.maximum(c, 1.0), 0.)

    loss = 0.6 * mmean(orig) + 0.1 * mmean(new) + 0.3 * mmean(sub)
    return loss, logits


# ----------------------------------------------------------------------------
# Main
# ----------------------------------------------------------------------------
if __name__ == "__main__":
    H = 256                # hidden_size
    V_ORIG = 448           # original_vocab_size (deliberately not tile-aligned)
    N_NEW = 192            # num_new_tokens
    V = V_ORIG + N_NEW     # 640
    B, S = 2, 9            # batch, sequence length (before the 1-token shift)

    key = jax.random.PRNGKey(0)
    k = jax.random.split(key, 8)
    lm_head_W = (0.02 * jax.random.normal(k[1], (V, H))).astype(jnp.bfloat16)
    params = {
        "embed_W": (0.02 * jax.random.normal(k[0], (V, H))).astype(jnp.bfloat16),
        # lm_head weight stored pre-transposed ([H, V]) so the logits matmul is
        # MXU-native NN with a lane-dense V output (one-time layout choice).
        "lm_head_WT": jnp.asarray(lm_head_W.T),
        "embedding_calibrator_W":
            (0.01 * jax.random.normal(k[2], (H, H))).astype(jnp.bfloat16),
        "unembedding_calibrator_W":
            (0.01 * jax.random.normal(k[3], (H, H))).astype(jnp.bfloat16),
        # LogitsCalibrator: nn.Linear(V, 1, bias=False) weight -> (1, V) bf16
        "logits_calibrator_W":
            (0.01 * jax.random.normal(k[4], (1, V))).astype(jnp.bfloat16),
        # synthetic base-model weight
        "base_W": (0.05 * jax.random.normal(k[5], (H, H))).astype(jnp.bfloat16),
    }

    input_ids = jax.random.randint(k[6], (B, S), 0, V, dtype=jnp.int32)
    labels = jax.random.randint(k[7], (B, S), 0, V, dtype=jnp.int32)
    # guarantee non-empty original / new / subsequent token groups
    labels = labels.at[:, 1].set(5)            # original token
    labels = labels.at[:, 3].set(V_ORIG + 2)   # new token -> next pos subsequent

    fwd = jax.jit(
        modified_model_forward,
        static_argnames=("new_tokens_start", "new_tokens_end",
                         "calibrate_lm_head", "calibrate_embedding",
                         "calibrate_logits", "return_logits",
                         "tm", "tn", "tk"))

    ref_loss, ref_logits = _reference_forward(
        params, input_ids, labels, new_start=V_ORIG, new_end=V)

    # 1) default (generation-aware) tiles: H fits VMEM -> 2-D fused grid
    #    (K axis dropped, h never re-streamed per V tile).
    out = fwd(params, input_ids, labels,
              new_tokens_start=V_ORIG, new_tokens_end=V)
    jax.block_until_ready(out)
    assert out["logits"].shape == (B, S - 1, V)
    assert bool(jnp.isfinite(out["loss"]))
    np.testing.assert_allclose(
        np.asarray(jnp.asarray(out["logits"], jnp.float32)),
        np.asarray(ref_logits), atol=5e-2, rtol=0)
    assert abs(float(out["loss"]) - float(ref_loss)) < 1e-1

    # 2) explicit small tiles: 3-D grid (1, 5, 2) exercising K accumulation,
    #    the V-wise online softmax, and the partially-overlapping calibrated
    #    V tile (448 is not a multiple of tn=128).
    out3d = fwd(params, input_ids, labels,
                new_tokens_start=V_ORIG, new_tokens_end=V,
                tm=16, tn=128, tk=128)
    jax.block_until_ready(out3d)
    np.testing.assert_allclose(
        np.asarray(jnp.asarray(out3d["logits"], jnp.float32)),
        np.asarray(ref_logits), atol=5e-2, rtol=0)
    assert abs(float(out3d["loss"]) - float(ref_loss)) < 1e-1

    # 3) calibrate_logits=True path: fused gamma scaling + tiled online CE.
    ref_loss_cl, ref_logits_cl = _reference_forward(
        params, input_ids, labels, new_start=V_ORIG, new_end=V,
        calibrate_logits=True)
    out_cl = fwd(params, input_ids, labels,
                 new_tokens_start=V_ORIG, new_tokens_end=V,
                 calibrate_logits=True, tm=16, tn=128, tk=128)
    jax.block_until_ready(out_cl)
    assert out_cl["logits"].shape == (B, S - 1, V)
    np.testing.assert_allclose(
        np.asarray(jnp.asarray(out_cl["logits"], jnp.float32)),
        np.asarray(ref_logits_cl), atol=5e-2, rtol=0)
    assert abs(float(out_cl["loss"]) - float(ref_loss_cl)) < 1e-1

    print("KERNEL_OK")
</pallas_src>

<mosaic_0001>
module attributes {stable_mosaic.version = 11 : i64} {
  func.func @kernel(%arg0: i32, %arg1: i32, %arg2: i32, %arg3: memref<16x256xbf16, #tpu.memory_space<vmem>>, %arg4: memref<16x1xi32, #tpu.memory_space<vmem>>, %arg5: memref<256x256xbf16, #tpu.memory_space<vmem>>, %arg6: memref<16x256xbf16, #tpu.memory_space<vmem>>, %arg7: memref<16x256xbf16, #tpu.memory_space<vmem>>, %arg8: memref<16x256xf32, #tpu.memory_space<vmem>>) attributes {dimension_semantics = [#tpu.dimension_semantics<parallel>, #tpu.dimension_semantics<parallel>, #tpu.dimension_semantics<arbitrary>], iteration_bounds = array<i64: 1, 1, 1>, scalar_prefetch = 0 : i64, scratch_operands = 1 : i64, tpu.core_type = #tpu.core_type<tc>, window_params = [{transform_indices = @transform_0, window_bounds = array<i64: 16, 256>}, {transform_indices = @transform_1, window_bounds = array<i64: 16, 1>}, {transform_indices = @transform_2, window_bounds = array<i64: 256, 256>}, {transform_indices = @transform_3, window_bounds = array<i64: 16, 256>}, {transform_indices = @transform_4, window_bounds = array<i64: 16, 256>}]} {
    %c0_i32 = arith.constant 0 : i32
    %0 = arith.cmpi eq, %arg2, %c0_i32 : i32
    %1 = arith.extui %0 : i1 to i32
    %c0_i32_0 = arith.constant 0 : i32
    %2 = arith.cmpi ne, %1, %c0_i32_0 : i32
    scf.if %2 {
      %cst_10 = arith.constant 0.000000e+00 : f32
      %12 = vector.broadcast %cst_10 : f32 to vector<16x256xf32>
      %c0_11 = arith.constant 0 : index
      %c0_12 = arith.constant 0 : index
      %13 = vector.load %arg8[%c0_11, %c0_12] : memref<16x256xf32, #tpu.memory_space<vmem>>, vector<16x256xf32>
      tpu.vector_store %arg8[%c0_11, %c0_12], %12 {strides = array<i32>} : memref<16x256xf32, #tpu.memory_space<vmem>>, vector<16x256xf32>,
    } else {
    }
    %c0 = arith.constant 0 : index
    %c0_1 = arith.constant 0 : index
    %3 = vector.load %arg8[%c0, %c0_1] : memref<16x256xf32, #tpu.memory_space<vmem>>, vector<16x256xf32>
    %c0_2 = arith.constant 0 : index
    %c0_3 = arith.constant 0 : index
    %4 = vector.load %arg3[%c0_2, %c0_3] : memref<16x256xbf16, #tpu.memory_space<vmem>>, vector<16x256xbf16>
    %c0_4 = arith.constant 0 : index
    %c0_5 = arith.constant 0 : index
    %5 = vector.load %arg5[%c0_4, %c0_5] : memref<256x256xbf16, #tpu.memory_space<vmem>>, vector<256x256xbf16>
    %cst = arith.constant dense<0.000000e+00> : vector<16x256xf32>
    %6 = tpu.matmul %4, %5, %cst {dimension_numbers = #tpu.dot_dimension_numbers<[1], [1], [0], [0], [0, 0, 1, 0], [], []>} : vector<16x256xbf16>, vector<256x256xbf16>, vector<16x256xf32> -> vector<16x256xf32>
    %7 = arith.addf %3, %6 : vector<16x256xf32>
    %c0_6 = arith.constant 0 : index
    %c0_7 = arith.constant 0 : index
    %8 = vector.load %arg8[%c0_6, %c0_7] : memref<16x256xf32, #tpu.memory_space<vmem>>, vector<16x256xf32>
    tpu.vector_store %arg8[%c0_6, %c0_7], %7 {strides = array<i32>} : memref<16x256xf32, #tpu.memory_space<vmem>>, vector<16x256xf32>,
    %c0_i32_8 = arith.constant 0 : i32
    %9 = arith.cmpi eq, %arg2, %c0_i32_8 : i32
    %10 = arith.extui %9 : i1 to i32
    %c0_i32_9 = arith.constant 0 : i32
    %11 = arith.cmpi ne, %10, %c0_i32_9 : i32
    scf.if %11 {
      %c0_10 = arith.constant 0 : index
      %c0_11 = arith.constant 0 : index
      %12 = vector.load %arg4[%c0_10, %c0_11] : memref<16x1xi32, #tpu.memory_space<vmem>>, vector<16x1xi32>
      %c448_i32 = arith.constant 448 : i32
      %13 = vector.broadcast %c448_i32 : i32 to vector<16x1xi32>
      %14 = arith.cmpi sge, %12, %13 : vector<16x1xi32>
      %c0_12 = arith.constant 0 : index
      %c0_13 = arith.constant 0 : index
      %15 = vector.load %arg6[%c0_12, %c0_13] : memref<16x256xbf16, #tpu.memory_space<vmem>>, vector<16x256xbf16>
      %16 = arith.extf %15 : vector<16x256xbf16> to vector<16x256xf32>
      %c0_14 = arith.constant 0 : index
      %c0_15 = arith.constant 0 : index
      %17 = vector.load %arg8[%c0_14, %c0_15] : memref<16x256xf32, #tpu.memory_space<vmem>>, vector<16x256xf32>
      %cst_16 = arith.constant 0.000000e+00 : f32
      %18 = vector.shape_cast %14 : vector<16x1xi1> to vector<16x1xi1>
      %19 = vector.broadcast %18 : vector<16x1xi1> to vector<16x256xi1>
      %20 = vector.broadcast %cst_16 : f32 to vector<16x256xf32>
      %21 = arith.select %19, %17, %20 : vector<16x256xi1>, vector<16x256xf32>
      %22 = arith.addf %16, %21 : vector<16x256xf32>
      %23 = arith.truncf %22 : vector<16x256xf32> to vector<16x256xbf16>
      %c0_17 = arith.constant 0 : index
      %c0_18 = arith.constant 0 : index
      %24 = vector.load %arg7[%c0_17, %c0_18] : memref<16x256xbf16, #tpu.memory_space<vmem>>, vector<16x256xbf16>
      tpu.vector_store %arg7[%c0_17, %c0_18], %23 {strides = array<i32>} : memref<16x256xbf16, #tpu.memory_space<vmem>>, vector<16x256xbf16>,
    } else {
    }
    return
  }
  func.func @transform_0(%arg0: i32, %arg1: i32, %arg2: i32) -> (i32, i32) {
    %c0_i32 = arith.constant 0 : i32
    return %arg0, %arg2 : i32, i32
  }
  func.func @transform_1(%arg0: i32, %arg1: i32, %arg2: i32) -> (i32, i32) {
    %c0_i32 = arith.constant 0 : i32
    %c0_i32_0 = arith.constant 0 : i32
    return %arg0, %c0_i32 : i32, i32
  }
  func.func @transform_2(%arg0: i32, %arg1: i32, %arg2: i32) -> (i32, i32) {
    %c0_i32 = arith.constant 0 : i32
    return %arg1, %arg2 : i32, i32
  }
  func.func @transform_3(%arg0: i32, %arg1: i32, %arg2: i32) -> (i32, i32) {
    %c0_i32 = arith.constant 0 : i32
    return %arg0, %arg1 : i32, i32
  }
  func.func @transform_4(%arg0: i32, %arg1: i32, %arg2: i32) -> (i32, i32) {
    %c0_i32 = arith.constant 0 : i32
    return %arg0, %arg1 : i32, i32
  }
}

module attributes {stable_mosaic.version = 11 : i64} {
  func.func @kernel(%arg0: i32, %arg1: i32, %arg2: memref<16x256xbf16, #tpu.memory_space<vmem>>, %arg3: memref<16x256xbf16, #tpu.memory_space<vmem>>, %arg4: memref<256x640xbf16, #tpu.memory_space<vmem>>, %arg5: memref<16x1xi32, #tpu.memory_space<vmem>>, %arg6: memref<16x640xbf16, #tpu.memory_space<vmem>>, %arg7: memref<16x1xf32, #tpu.memory_space<vmem>>, %arg8: memref<16x640xf32, #tpu.memory_space<vmem>>, %arg9: memref<16x1xf32, #tpu.memory_space<vmem>>, %arg10: memref<16x1xf32, #tpu.memory_space<vmem>>, %arg11: memref<16x1xf32, #tpu.memory_space<vmem>>) attributes {dimension_semantics = [#tpu.dimension_semantics<parallel>, #tpu.dimension_semantics<arbitrary>], iteration_bounds = array<i64: 1, 1>, scalar_prefetch = 0 : i64, scratch_operands = 4 : i64, tpu.core_type = #tpu.core_type<tc>, window_params = [{transform_indices = @transform_0, window_bounds = array<i64: 16, 256>}, {transform_indices = @transform_1, window_bounds = array<i64: 16, 256>}, {transform_indices = @transform_2, window_bounds = array<i64: 256, 640>}, {transform_indices = @transform_3, window_bounds = array<i64: 16, 1>}, {transform_indices = @transform_4, window_bounds = array<i64: 16, 640>}, {transform_indices = @transform_5, window_bounds = array<i64: 16, 1>}]} {
    %c640_i32 = arith.constant 640 : i32
    %0 = arith.muli %arg1, %c640_i32 : i32
    %1 = tpu.iota {dimensions = array<i32: 1>} : vector<1x640xi32>
    %2 = vector.broadcast %0 : i32 to vector<1x640xi32>
    %3 = arith.addi %2, %1 : vector<1x640xi32>
    %c0 = arith.constant 0 : index
    %c0_0 = arith.constant 0 : index
    %4 = vector.load %arg2[%c0, %c0_0] : memref<16x256xbf16, #tpu.memory_space<vmem>>, vector<16x256xbf16>
    %c0_1 = arith.constant 0 : index
    %c0_2 = arith.constant 0 : index
    %5 = vector.load %arg4[%c0_1, %c0_2] : memref<256x640xbf16, #tpu.memory_space<vmem>>, vector<256x640xbf16>
    %cst = arith.constant dense<0.000000e+00> : vector<16x640xf32>
    %6 = tpu.matmul %4, %5, %cst {dimension_numbers = #tpu.dot_dimension_numbers<[1], [0], [0], [1], [0, 0, 1, 1], [], []>} : vector<16x256xbf16>, vector<256x640xbf16>, vector<16x640xf32> -> vector<16x640xf32>
    %c0_3 = arith.constant 0 : index
    %c0_4 = arith.constant 0 : index
    %7 = vector.load %arg8[%c0_3, %c0_4] : memref<16x640xf32, #tpu.memory_space<vmem>>, vector<16x640xf32>
    tpu.vector_store %arg8[%c0_3, %c0_4], %6 {strides = array<i32>} : memref<16x640xf32, #tpu.memory_space<vmem>>, vector<16x640xf32>,
    %c640_i32_5 = arith.constant 640 : i32
    %8 = arith.muli %arg1, %c640_i32_5 : i32
    %c640_i32_6 = arith.constant 640 : i32
    %9 = arith.cmpi slt, %8, %c640_i32_6 : i32
    %c640_i32_7 = arith.constant 640 : i32
    %10 = arith.addi %8, %c640_i32_7 : i32
    %c448_i32 = arith.constant 448 : i32
    %11 = arith.cmpi sgt, %10, %c448_i32 : i32
    %12 = arith.andi %9, %11 : i1
    %13 = arith.extui %12 : i1 to i32
    %c0_i32 = arith.constant 0 : i32
    %14 = arith.cmpi ne, %13, %c0_i32 : i32
    scf.if %14 {
      %c0_34 = arith.constant 0 : index
      %c0_35 = arith.constant 0 : index
      %51 = vector.load %arg3[%c0_34, %c0_35] : memref<16x256xbf16, #tpu.memory_space<vmem>>, vector<16x256xbf16>
      %c0_36 = arith.constant 0 : index
      %c0_37 = arith.constant 0 : index
      %52 = vector.load %arg4[%c0_36, %c0_37] : memref<256x640xbf16, #tpu.memory_space<vmem>>, vector<256x640xbf16>
      %cst_38 = arith.constant dense<0.000000e+00> : vector<16x640xf32>
      %53 = tpu.matmul %51, %52, %cst_38 {dimension_numbers = #tpu.dot_dimension_numbers<[1], [0], [0], [1], [0, 0, 1, 1], [], []>} : vector<16x256xbf16>, vector<256x640xbf16>, vector<16x640xf32> -> vector<16x640xf32>
      %c448_i32_39 = arith.constant 448 : i32
      %54 = vector.broadcast %c448_i32_39 : i32 to vector<1x640xi32>
      %55 = arith.cmpi sge, %3, %54 : vector<1x640xi32>
      %c640_i32_40 = arith.constant 640 : i32
      %56 = vector.broadcast %c640_i32_40 : i32 to vector<1x640xi32>
      %57 = arith.cmpi slt, %3, %56 : vector<1x640xi32>
      %58 = arith.andi %55, %57 : vector<1x640xi1>
      %c0_41 = arith.constant 0 : index
      %c0_42 = arith.constant 0 : index
      %59 = vector.load %arg8[%c0_41, %c0_42] : memref<16x640xf32, #tpu.memory_space<vmem>>, vector<16x640xf32>
      %cst_43 = arith.constant 0.000000e+00 : f32
      %60 = vector.shape_cast %58 : vector<1x640xi1> to vector<1x640xi1>
      %61 = vector.broadcast %60 : vector<1x640xi1> to vector<16x640xi1>
      %62 = vector.broadcast %cst_43 : f32 to vector<16x640xf32>
      %63 = arith.select %61, %53, %62 : vector<16x640xi1>, vector<16x640xf32>
      %64 = arith.addf %59, %63 : vector<16x640xf32>
      %c0_44 = arith.constant 0 : index
      %c0_45 = arith.constant 0 : index
      %65 = vector.load %arg8[%c0_44, %c0_45] : memref<16x640xf32, #tpu.memory_space<vmem>>, vector<16x640xf32>
      tpu.vector_store %arg8[%c0_44, %c0_45], %64 {strides = array<i32>} : memref<16x640xf32, #tpu.memory_space<vmem>>, vector<16x640xf32>,
    } else {
    }
    %c0_8 = arith.constant 0 : index
    %c0_9 = arith.constant 0 : index
    %15 = vector.load %arg8[%c0_8, %c0_9] : memref<16x640xf32, #tpu.memory_space<vmem>>, vector<16x640xf32>
    %16 = arith.truncf %15 : vector<16x640xf32> to vector<16x640xbf16>
    %c0_10 = arith.constant 0 : index
    %c0_11 = arith.constant 0 : index
    %17 = vector.load %arg6[%c0_10, %c0_11] : memref<16x640xbf16, #tpu.memory_space<vmem>>, vector<16x640xbf16>
    tpu.vector_store %arg6[%c0_10, %c0_11], %16 {strides = array<i32>} : memref<16x640xbf16, #tpu.memory_space<vmem>>, vector<16x640xbf16>,
    %c0_i32_12 = arith.constant 0 : i32
    %18 = arith.cmpi eq, %arg1, %c0_i32_12 : i32
    %19 = arith.extui %18 : i1 to i32
    %c0_i32_13 = arith.constant 0 : i32
    %20 = arith.cmpi ne, %19, %c0_i32_13 : i32
    scf.if %20 {
      %cst_34 = arith.constant 0xFF800000 : f32
      %51 = vector.broadcast %cst_34 : f32 to vector<16x1xf32>
      %c0_35 = arith.constant 0 : index
      %c0_36 = arith.constant 0 : index
      %52 = vector.load %arg9[%c0_35, %c0_36] : memref<16x1xf32, #tpu.memory_space<vmem>>, vector<16x1xf32>
      tpu.vector_store %arg9[%c0_35, %c0_36], %51 {strides = array<i32>} : memref<16x1xf32, #tpu.memory_space<vmem>>, vector<16x1xf32>,
      %cst_37 = arith.constant 0.000000e+00 : f32
      %53 = vector.broadcast %cst_37 : f32 to vector<16x1xf32>
      %c0_38 = arith.constant 0 : index
      %c0_39 = arith.constant 0 : index
      %54 = vector.load %arg10[%c0_38, %c0_39] : memref<16x1xf32, #tpu.memory_space<vmem>>, vector<16x1xf32>
      tpu.vector_store %arg10[%c0_38, %c0_39], %53 {strides = array<i32>} : memref<16x1xf32, #tpu.memory_space<vmem>>, vector<16x1xf32>,
      %cst_40 = arith.constant 0.000000e+00 : f32
      %55 = vector.broadcast %cst_40 : f32 to vector<16x1xf32>
      %c0_41 = arith.constant 0 : index
      %c0_42 = arith.constant 0 : index
      %56 = vector.load %arg11[%c0_41, %c0_42] : memref<16x1xf32, #tpu.memory_space<vmem>>, vector<16x1xf32>
      tpu.vector_store %arg11[%c0_41, %c0_42], %55 {strides = array<i32>} : memref<16x1xf32, #tpu.memory_space<vmem>>, vector<16x1xf32>,
    } else {
    }
    %c0_14 = arith.constant 0 : index
    %c0_15 = arith.constant 0 : index
    %21 = vector.load %arg9[%c0_14, %c0_15] : memref<16x1xf32, #tpu.memory_space<vmem>>, vector<16x1xf32>
    %cst_16 = arith.constant dense<0xFF800000> : vector<16xf32>
    %22 = vector.multi_reduction <maximumf>, %15, %cst_16 [1] : vector<16x640xf32> to vector<16xf32>
    %23 = vector.shape_cast %22 : vector<16xf32> to vector<16x1xf32>
    %24 = arith.maximumf %21, %23 : vector<16x1xf32>
    %c0_17 = arith.constant 0 : index
    %c0_18 = arith.constant 0 : index
    %25 = vector.load %arg10[%c0_17, %c0_18] : memref<16x1xf32, #tpu.memory_space<vmem>>, vector<16x1xf32>
    %26 = arith.subf %21, %24 : vector<16x1xf32>
    %27 = math.exp %26 : vector<16x1xf32>
    %28 = arith.mulf %25, %27 : vector<16x1xf32>
    %29 = vector.broadcast %24 : vector<16x1xf32> to vector<16x640xf32>
    %30 = arith.subf %15, %29 : vector<16x640xf32>
    %31 = math.exp %30 : vector<16x640xf32>
    %cst_19 = arith.constant dense<0.000000e+00> : vector<16xf32>
    %32 = vector.multi_reduction <add>, %31, %cst_19 [1] : vector<16x640xf32> to vector<16xf32>
    %33 = vector.shape_cast %32 : vector<16xf32> to vector<16x1xf32>
    %34 = arith.addf %28, %33 : vector<16x1xf32>
    %c0_20 = arith.constant 0 : index
    %c0_21 = arith.constant 0 : index
    %35 = vector.load %arg10[%c0_20, %c0_21] : memref<16x1xf32, #tpu.memory_space<vmem>>, vector<16x1xf32>
    tpu.vector_store %arg10[%c0_20, %c0_21], %34 {strides = array<i32>} : memref<16x1xf32, #tpu.memory_space<vmem>>, vector<16x1xf32>,
    %c0_22 = arith.constant 0 : index
    %c0_23 = arith.constant 0 : index
    %36 = vector.load %arg9[%c0_22, %c0_23] : memref<16x1xf32, #tpu.memory_space<vmem>>, vector<16x1xf32>
    tpu.vector_store %arg9[%c0_22, %c0_23], %24 {strides = array<i32>} : memref<16x1xf32, #tpu.memory_space<vmem>>, vector<16x1xf32>,
    %c0_24 = arith.constant 0 : index
    %c0_25 = arith.constant 0 : index
    %37 = vector.load %arg11[%c0_24, %c0_25] : memref<16x1xf32, #tpu.memory_space<vmem>>, vector<16x1xf32>
    %c0_26 = arith.constant 0 : index
    %c0_27 = arith.constant 0 : index
    %38 = vector.load %arg5[%c0_26, %c0_27] : memref<16x1xi32, #tpu.memory_space<vmem>>, vector<16x1xi32>
    %39 = vector.broadcast %3 : vector<1x640xi32> to vector<16x640xi32>
    %40 = vector.broadcast %38 : vector<16x1xi32> to vector<16x640xi32>
    %41 = arith.cmpi eq, %39, %40 : vector<16x640xi32>
    %cst_28 = arith.constant 0.000000e+00 : f32
    %42 = vector.broadcast %cst_28 : f32 to vector<16x640xf32>
    %43 = arith.select %41, %15, %42 : vector<16x640xi1>, vector<16x640xf32>
    %cst_29 = arith.constant dense<0.000000e+00> : vector<16xf32>
    %44 = vector.multi_reduction <add>, %43, %cst_29 [1] : vector<16x640xf32> to vector<16xf32>
    %45 = vector.shape_cast %44 : vector<16xf32> to vector<16x1xf32>
    %46 = arith.addf %37, %45 : vector<16x1xf32>
    %c0_30 = arith.constant 0 : index
    %c0_31 = arith.constant 0 : index
    %47 = vector.load %arg11[%c0_30, %c0_31] : memref<16x1xf32, #tpu.memory_space<vmem>>, vector<16x1xf32>
    tpu.vector_store %arg11[%c0_30, %c0_31], %46 {strides = array<i32>} : memref<16x1xf32, #tpu.memory_space<vmem>>, vector<16x1xf32>,
    %c0_i32_32 = arith.constant 0 : i32
    %48 = arith.cmpi eq, %arg1, %c0_i32_32 : i32
    %49 = arith.extui %48 : i1 to i32
    %c0_i32_33 = arith.constant 0 : i32
    %50 = arith.cmpi ne, %49, %c0_i32_33 : i32
    scf.if %50 {
      %c0_34 = arith.constant 0 : index
      %c0_35 = arith.constant 0 : index
      %51 = vector.load %arg9[%c0_34, %c0_35] : memref<16x1xf32, #tpu.memory_space<vmem>>, vector<16x1xf32>
      %c0_36 = arith.constant 0 : index
      %c0_37 = arith.constant 0 : index
      %52 = vector.load %arg10[%c0_36, %c0_37] : memref<16x1xf32, #tpu.memory_space<vmem>>, vector<16x1xf32>
      %53 = math.log %52 : vector<16x1xf32>
      %54 = arith.addf %51, %53 : vector<16x1xf32>
      %c0_38 = arith.constant 0 : index
      %c0_39 = arith.constant 0 : index
      %55 = vector.load %arg11[%c0_38, %c0_39] : memref<16x1xf32, #tpu.memory_space<vmem>>, vector<16x1xf32>
      %56 = arith.subf %54, %55 : vector<16x1xf32>
      %c0_40 = arith.constant 0 : index
      %c0_41 = arith.constant 0 : index
      %57 = vector.load %arg5[%c0_40, %c0_41] : memref<16x1xi32, #tpu.memory_space<vmem>>, vector<16x1xi32>
      %c0_i32_42 = arith.constant 0 : i32
      %58 = vector.broadcast %c0_i32_42 : i32 to vector<16x1xi32>
      %59 = arith.cmpi slt, %57, %58 : vector<16x1xi32>
      %cst_43 = arith.constant 0.000000e+00 : f32
      %60 = vector.broadcast %cst_43 : f32 to vector<16x1xf32>
      %61 = arith.select %59, %60, %56 : vector<16x1xi1>, vector<16x1xf32>
      %c0_44 = arith.constant 0 : index
      %c0_45 = arith.constant 0 : index
      %62 = vector.load %arg7[%c0_44, %c0_45] : memref<16x1xf32, #tpu.memory_space<vmem>>, vector<16x1xf32>
      tpu.vector_store %arg7[%c0_44, %c0_45], %61 {strides = array<i32>} : memref<16x1xf32, #tpu.memory_space<vmem>>, vector<16x1xf32>,
    } else {
    }
    return
  }
  func.func @transform_0(%arg0: i32, %arg1: i32) -> (i32, i32) {
    %c0_i32 = arith.constant 0 : i32
    %c0_i32_0 = arith.constant 0 : i32
    return %arg0, %c0_i32 : i32, i32
  }
  func.func @transform_1(%arg0: i32, %arg1: i32) -> (i32, i32) {
    %c0_i32 = arith.constant 0 : i32
    %c0_i32_0 = arith.constant 0 : i32
    return %arg0, %c0_i32 : i32, i32
  }
  func.func @transform_2(%arg0: i32, %arg1: i32) -> (i32, i32) {
    %c0_i32 = arith.constant 0 : i32
    %c0_i32_0 = arith.constant 0 : i32
    return %c0_i32, %arg1 : i32, i32
  }
  func.func @transform_3(%arg0: i32, %arg1: i32) -> (i32, i32) {
    %c0_i32 = arith.constant 0 : i32
    %c0_i32_0 = arith.constant 0 : i32
    return %arg0, %c0_i32 : i32, i32
  }
  func.func @transform_4(%arg0: i32, %arg1: i32) -> (i32, i32) {
    %c0_i32 = arith.constant 0 : i32
    return %arg0, %arg1 : i32, i32
  }
  func.func @transform_5(%arg0: i32, %arg1: i32) -> (i32, i32) {
    %c0_i32 = arith.constant 0 : i32
    %c0_i32_0 = arith.constant 0 : i32
    return %arg0, %c0_i32 : i32, i32
  }
}

module attributes {stable_mosaic.version = 11 : i64} {
  func.func @kernel(%arg0: i32, %arg1: i32, %arg2: i32, %arg3: memref<16x256xbf16, #tpu.memory_space<vmem>>, %arg4: memref<256x256xbf16, #tpu.memory_space<vmem>>, %arg5: memref<16x256xbf16, #tpu.memory_space<vmem>>, %arg6: memref<16x256xf32, #tpu.memory_space<vmem>>) attributes {dimension_semantics = [#tpu.dimension_semantics<parallel>, #tpu.dimension_semantics<parallel>, #tpu.dimension_semantics<arbitrary>], iteration_bounds = array<i64: 1, 1, 1>, scalar_prefetch = 0 : i64, scratch_operands = 1 : i64, tpu.core_type = #tpu.core_type<tc>, window_params = [{transform_indices = @transform_0, window_bounds = array<i64: 16, 256>}, {transform_indices = @transform_1, window_bounds = array<i64: 256, 256>}, {transform_indices = @transform_2, window_bounds = array<i64: 16, 256>}]} {
    %c0_i32 = arith.constant 0 : i32
    %0 = arith.cmpi eq, %arg2, %c0_i32 : i32
    %1 = arith.extui %0 : i1 to i32
    %c0_i32_0 = arith.constant 0 : i32
    %2 = arith.cmpi ne, %1, %c0_i32_0 : i32
    scf.if %2 {
      %cst_10 = arith.constant 0.000000e+00 : f32
      %12 = vector.broadcast %cst_10 : f32 to vector<16x256xf32>
      %c0_11 = arith.constant 0 : index
      %c0_12 = arith.constant 0 : index
      %13 = vector.load %arg6[%c0_11, %c0_12] : memref<16x256xf32, #tpu.memory_space<vmem>>, vector<16x256xf32>
      tpu.vector_store %arg6[%c0_11, %c0_12], %12 {strides = array<i32>} : memref<16x256xf32, #tpu.memory_space<vmem>>, vector<16x256xf32>,
    } else {
    }
    %c0 = arith.constant 0 : index
    %c0_1 = arith.constant 0 : index
    %3 = vector.load %arg6[%c0, %c0_1] : memref<16x256xf32, #tpu.memory_space<vmem>>, vector<16x256xf32>
    %c0_2 = arith.constant 0 : index
    %c0_3 = arith.constant 0 : index
    %4 = vector.load %arg3[%c0_2, %c0_3] : memref<16x256xbf16, #tpu.memory_space<vmem>>, vector<16x256xbf16>
    %c0_4 = arith.constant 0 : index
    %c0_5 = arith.constant 0 : index
    %5 = vector.load %arg4[%c0_4, %c0_5] : memref<256x256xbf16, #tpu.memory_space<vmem>>, vector<256x256xbf16>
    %cst = arith.constant dense<0.000000e+00> : vector<16x256xf32>
    %6 = tpu.matmul %4, %5, %cst {dimension_numbers = #tpu.dot_dimension_numbers<[1], [0], [0], [1], [0, 0, 1, 1], [], []>} : vector<16x256xbf16>, vector<256x256xbf16>, vector<16x256xf32> -> vector<16x256xf32>
    %7 = arith.addf %3, %6 : vector<16x256xf32>
    %c0_6 = arith.constant 0 : index
    %c0_7 = arith.constant 0 : index
    %8 = vector.load %arg6[%c0_6, %c0_7] : memref<16x256xf32, #tpu.memory_space<vmem>>, vector<16x256xf32>
    tpu.vector_store %arg6[%c0_6, %c0_7], %7 {strides = array<i32>} : memref<16x256xf32, #tpu.memory_space<vmem>>, vector<16x256xf32>,
    %c0_i32_8 = arith.constant 0 : i32
    %9 = arith.cmpi eq, %arg2, %c0_i32_8 : i32
    %10 = arith.extui %9 : i1 to i32
    %c0_i32_9 = arith.constant 0 : i32
    %11 = arith.cmpi ne, %10, %c0_i32_9 : i32
    scf.if %11 {
      %c0_10 = arith.constant 0 : index
      %c0_11 = arith.constant 0 : index
      %12 = vector.load %arg6[%c0_10, %c0_11] : memref<16x256xf32, #tpu.memory_space<vmem>>, vector<16x256xf32>
      %13 = arith.truncf %12 : vector<16x256xf32> to vector<16x256xbf16>
      %c0_12 = arith.constant 0 : index
      %c0_13 = arith.constant 0 : index
      %14 = vector.load %arg5[%c0_12, %c0_13] : memref<16x256xbf16, #tpu.memory_space<vmem>>, vector<16x256xbf16>
      tpu.vector_store %arg5[%c0_12, %c0_13], %13 {strides = array<i32>} : memref<16x256xbf16, #tpu.memory_space<vmem>>, vector<16x256xbf16>,
    } else {
    }
    return
  }
  func.func @transform_0(%arg0: i32, %arg1: i32, %arg2: i32) -> (i32, i32) {
    %c0_i32 = arith.constant 0 : i32
    return %arg0, %arg2 : i32, i32
  }
  func.func @transform_1(%arg0: i32, %arg1: i32, %arg2: i32) -> (i32, i32) {
    %c0_i32 = arith.constant 0 : i32
    return %arg2, %arg1 : i32, i32
  }
  func.func @transform_2(%arg0: i32, %arg1: i32, %arg2: i32) -> (i32, i32) {
    %c0_i32 = arith.constant 0 : i32
    return %arg0, %arg1 : i32, i32
  }
}

</mosaic_0001>

<bundles_post_ra>
// kernel: modified_model_forward.4
= control target key start
LH: loop header
LB: loop body
LE: loop exit
PB: predicated region body
PF: predicated region fallthrough
CT: control target
= control target key end

     0   :  { %s701_s1 = inlined_call_operand.vmem [shape: bf16[256,256], index: 1, kind: input, shape index: {}]   ;;  %s702_s0 = inlined_call_operand.vmem [shape: bf16[16,256], index: 0, kind: input, shape index: {}]   ;;  %s703_s2 = inlined_call_operand.vmem [shape: bf16[16,256], index: 2, kind: output, shape index: {}]  }
   0x1   :  { %v372_v0 = vld [vmem:[%s701_s1 + $0x70] sm:$0xf]  ;;  %v459_v1 = vld [vmem:[%s701_s1 + $0x74] sm:$0xf0]  ;;  %v458_v5 = vld [vmem:[%s701_s1 + $0x74] sm:$0xf] }
   0x2   :  { %v436_v2 = vld [vmem:[%s701_s1 + $0xf0] sm:$0xf]  ;;  %v373_v3 = vor.u32 %v459_v1, %v372_v0  ;;  %v475_v4 = vld [vmem:[%s701_s1 + $0xf4] sm:$0xf0]  ;;  %v374_v6 = vld [vmem:[%s701_s1 + $0x78] sm:$0xf0] }
   0x3   :  { %v437_v7 = vor.u32 %v475_v4, %v436_v2  ;;  %v377_v8 = vor.u32 %v458_v5, %v374_v6  ;;  %v474_v9 = vld [vmem:[%s701_s1 + $0xf4] sm:$0xf]  ;;  %v438_v10 = vld [vmem:[%s701_s1 + $0xf8] sm:$0xf0]  ;;  %v364_v11 = vld [vmem:[%s701_s1 + $0x60] sm:$0xf] }
   0x4   :  { %227 = vmatpush.bf16.msra.mxu0 %v373_v3  ;;  %v441_v12 = vor.u32 %v474_v9, %v438_v10  ;;  %v457_v13 = vld [vmem:[%s701_s1 + $0x64] sm:$0xf0]  ;;  %v428_v14 = vld [vmem:[%s701_s1 + $0xe0] sm:$0xf]  ;;  %v456_v18 = vld [vmem:[%s701_s1 + $0x64] sm:$0xf] }
   0x5   :  { %v473_v15 = vld [vmem:[%s701_s1 + $0xe4] sm:$0xf0]  ;;  %241 = vmatpush.bf16.msra.mxu1 %v437_v7  ;;  %255 = vmatpush.bf16.msra.mxu2 %v377_v8  ;;  %v365_v16 = vor.u32 %v457_v13, %v364_v11  ;;  %v366_v19 = vld [vmem:[%s701_s1 + $0x68] sm:$0xf0]  ;;  %v472_v20 = vld [vmem:[%s701_s1 + $0xe4] sm:$0xf] }
   0x6   :  { %v429_v17 = vor.u32 %v473_v15, %v428_v14  ;;  %269 = vmatpush.bf16.msra.mxu3 %v441_v12  ;;  %v369_v21 = vor.u32 %v456_v18, %v366_v19  ;;  %v430_v22 = vld [vmem:[%s701_s1 + $0xe8] sm:$0xf0]  ;;  %v356_v23 = vld [vmem:[%s701_s1 + $0x50] sm:$0xf]  ;;  %v455_v24 = vld [vmem:[%s701_s1 + $0x54] sm:$0xf0] }
   0x7   :  { %v433_v25 = vor.u32 %v472_v20, %v430_v22  ;;  %v420_v26 = vld [vmem:[%s701_s1 + $0xd0] sm:$0xf]  ;;  %v471_v27 = vld [vmem:[%s701_s1 + $0xd4] sm:$0xf0]  ;;  %v454_v28 = vld [vmem:[%s701_s1 + $0x54] sm:$0xf]  ;;  %v357_v29 = vor.u32 %v455_v24, %v356_v23 }
   0x8   :  { %228 = vmatpush.bf16.msra.mxu0 %v365_v16  ;;  %v358_v30 = vld [vmem:[%s701_s1 + $0x58] sm:$0xf0]  ;;  %v470_v31 = vld [vmem:[%s701_s1 + $0xd4] sm:$0xf]  ;;  %v421_v33 = vor.u32 %v471_v27, %v420_v26  ;;  %v348_v35 = vld [vmem:[%s701_s1 + $0x40] sm:$0xf] }
   0x9   :  { %v422_v32 = vld [vmem:[%s701_s1 + $0xd8] sm:$0xf0]  ;;  %242 = vmatpush.bf16.msra.mxu1 %v429_v17  ;;  %256 = vmatpush.bf16.msra.mxu2 %v369_v21  ;;  %v361_v34 = vor.u32 %v454_v28, %v358_v30  ;;  %v453_v36 = vld [vmem:[%s701_s1 + $0x44] sm:$0xf0]  ;;  %v412_v37 = vld [vmem:[%s701_s1 + $0xc0] sm:$0xf] }
   0xa   :  { %270 = vmatpush.bf16.msra.mxu3 %v433_v25  ;;  %v425_v38 = vor.u32 %v470_v31, %v422_v32  ;;  %v469_v39 = vld [vmem:[%s701_s1 + $0xc4] sm:$0xf0]  ;;  %v452_v40 = vld [vmem:[%s701_s1 + $0x44] sm:$0xf]  ;;  %v350_v41 = vld [vmem:[%s701_s1 + $0x48] sm:$0xf0]  ;;  %v349_v44 = vor.u32 %v453_v36, %v348_v35 }
   0xb   :  { %v468_v42 = vld [vmem:[%s701_s1 + $0xc4] sm:$0xf]  ;;  %v414_v43 = vld [vmem:[%s701_s1 + $0xc8] sm:$0xf0]  ;;  %v413_v45 = vor.u32 %v469_v39, %v412_v37  ;;  %v353_v46 = vor.u32 %v452_v40, %v350_v41  ;;  %v340_v47 = vld [vmem:[%s701_s1 + $0x30] sm:$0xf] }
   0xc   :  { %229 = vmatpush.bf16.msra.mxu0 %v357_v29  ;;  %v451_v48 = vld [vmem:[%s701_s1 + $0x34] sm:$0xf0]  ;;  %v404_v49 = vld [vmem:[%s701_s1 + $0xb0] sm:$0xf]  ;;  %v417_v50 = vor.u32 %v468_v42, %v414_v43  ;;  %v450_v52 = vld [vmem:[%s701_s1 + $0x34] sm:$0xf] }
   0xd   :  { %243 = vmatpush.bf16.msra.mxu1 %v421_v33  ;;  %257 = vmatpush.bf16.msra.mxu2 %v361_v34  ;;  %v467_v51 = vld [vmem:[%s701_s1 + $0xb4] sm:$0xf0]  ;;  %v342_v53 = vld [vmem:[%s701_s1 + $0x38] sm:$0xf0]  ;;  %v466_v54 = vld [vmem:[%s701_s1 + $0xb4] sm:$0xf]  ;;  %v341_v56 = vor.u32 %v451_v48, %v340_v47 }
   0xe   :  { %271 = vmatpush.bf16.msra.mxu3 %v425_v38  ;;  %v406_v55 = vld [vmem:[%s701_s1 + $0xb8] sm:$0xf0]  ;;  %v405_v57 = vor.u32 %v467_v51, %v404_v49  ;;  %v345_v58 = vor.u32 %v450_v52, %v342_v53  ;;  %v332_v59 = vld [vmem:[%s701_s1 + $0x20] sm:$0xf]  ;;  %v449_v60 = vld [vmem:[%s701_s1 + $0x24] sm:$0xf0] }
   0xf   :  { %v396_v61 = vld [vmem:[%s701_s1 + $0xa0] sm:$0xf]  ;;  %v409_v62 = vor.u32 %v466_v54, %v406_v55  ;;  %v465_v63 = vld [vmem:[%s701_s1 + $0xa4] sm:$0xf0]  ;;  %v448_v0 = vld [vmem:[%s701_s1 + $0x24] sm:$0xf]  ;;  %v333_v4 = vor.u32 %v449_v60, %v332_v59 }
  0x10   :  { %230 = vmatpush.bf16.msra.mxu0 %v349_v44  ;;  %v334_v1 = vld [vmem:[%s701_s1 + $0x28] sm:$0xf0]  ;;  %v464_v2 = vld [vmem:[%s701_s1 + $0xa4] sm:$0xf]  ;;  %v397_v5 = vor.u32 %v465_v63, %v396_v61  ;;  %v324_v7 = vld [vmem:[%s701_s1 + $0x10] sm:$0xf] }
  0x11   :  { %244 = vmatpush.bf16.msra.mxu1 %v413_v45  ;;  %258 = vmatpush.bf16.msra.mxu2 %v353_v46  ;;  %v398_v3 = vld [vmem:[%s701_s1 + $0xa8] sm:$0xf0]  ;;  %v337_v6 = vor.u32 %v448_v0, %v334_v1  ;;  %v447_v8 = vld [vmem:[%s701_s1 + $0x14] sm:$0xf0]  ;;  %v388_v9 = vld [vmem:[%s701_s1 + $0x90] sm:$0xf] }
  0x12   :  { %272 = vmatpush.bf16.msra.mxu3 %v417_v50  ;;  %v401_v10 = vor.u32 %v464_v2, %v398_v3  ;;  %v463_v11 = vld [vmem:[%s701_s1 + $0x94] sm:$0xf0]  ;;  %v446_v12 = vld [vmem:[%s701_s1 + $0x14] sm:$0xf]  ;;  %v326_v13 = vld [vmem:[%s701_s1 + $0x18] sm:$0xf0]  ;;  %v325_v16 = vor.u32 %v447_v8, %v324_v7 }
  0x13   :  { %v462_v14 = vld [vmem:[%s701_s1 + $0x94] sm:$0xf]  ;;  %v390_v15 = vld [vmem:[%s701_s1 + $0x98] sm:$0xf0]  ;;  %v389_v17 = vor.u32 %v463_v11, %v388_v9  ;;  %v329_v18 = vor.u32 %v446_v12, %v326_v13  ;;  %v316_v19 = vld [vmem:[%s701_s1] sm:$0xf] }
  0x14   :  { %231 = vmatpush.bf16.msra.mxu0 %v341_v56  ;;  %v445_v20 = vld [vmem:[%s701_s1 + $0x4] sm:$0xf0]  ;;  %v380_v21 = vld [vmem:[%s701_s1 + $0x80] sm:$0xf]  ;;  %v393_v22 = vor.u32 %v462_v14, %v390_v15  ;;  %v444_v24 = vld [vmem:[%s701_s1 + $0x4] sm:$0xf] }
  0x15   :  { %245 = vmatpush.bf16.msra.mxu1 %v405_v57  ;;  %259 = vmatpush.bf16.msra.mxu2 %v345_v58  ;;  %v461_v23 = vld [vmem:[%s701_s1 + $0x84] sm:$0xf0]  ;;  %v318_v25 = vld [vmem:[%s701_s1 + $0x8] sm:$0xf0]  ;;  %v460_v26 = vld [vmem:[%s701_s1 + $0x84] sm:$0xf]  ;;  %v317_v28 = vor.u32 %v445_v20, %v316_v19 }
  0x16   :  { %273 = vmatpush.bf16.msra.mxu3 %v409_v62  ;;  %v382_v27 = vld [vmem:[%s701_s1 + $0x88] sm:$0xf0]  ;;  %v308_v29 = vld [vmem:[%s702_s0] sm:$0xf]  ;;  %v443_v30 = vld [vmem:[%s702_s0 + $0x4] sm:$0xf0]  ;;  %v381_v31 = vor.u32 %v461_v23, %v380_v21  ;;  %v321_v32 = vor.u32 %v444_v24, %v318_v25 }
  0x17   :  { %v442_v33 = vld [vmem:[%s702_s0 + $0x4] sm:$0xf]  ;;  %v310_v34 = vld [vmem:[%s702_s0 + $0x8] sm:$0xf0]  ;;  %v385_v35 = vor.u32 %v460_v26, %v382_v27  ;;  %v309_v36 = vor.u32 %v443_v30, %v308_v29 }
  0x18   :  { %232 = vmatpush.bf16.msra.mxu0 %v333_v4  ;;  %v313_v37 = vor.u32 %v442_v33, %v310_v34 }
  0x19   :  { %246 = vmatpush.bf16.msra.mxu1 %v397_v5  ;;  %260 = vmatpush.bf16.msra.mxu2 %v337_v6 }
  0x1a   :  { %274 = vmatpush.bf16.msra.mxu3 %v401_v10 }
  0x1c   :  { %233 = vmatpush.bf16.msra.mxu0 %v325_v16 }
  0x1d   :  { %247 = vmatpush.bf16.msra.mxu1 %v389_v17  ;;  %261 = vmatpush.bf16.msra.mxu2 %v329_v18 }
  0x1e   :  { %275 = vmatpush.bf16.msra.mxu3 %v393_v22 }
  0x20   :  { %234 = vmatpush.bf16.msra.mxu0 %v317_v28 }
  0x21   :  { %248 = vmatpush.bf16.msra.mxu1 %v381_v31  ;;  %262 = vmatpush.bf16.msra.mxu2 %v321_v32 }
  0x22   :  { %276 = vmatpush.bf16.msra.mxu3 %v385_v35 }
  0x23   :  { %235 = vmatmul.bf16.vlgmr.msra.gmra.mxu0 %v309_v36 }
  0x24   :  { %249 = vmatmul.bf16.vlgmr.msra.gmra.mxu1 %v313_v37  ;;  %263 = vmatmul.bf16.vlgmr.msra.gmra.mxu2 %v309_v36 }
  0x25   :  { %277 = vmatmul.bf16.vlgmr.msra.gmra.mxu3 %v313_v37 }
  0xa0   :  { %v236_v38 = vpop.f32.mrf.mxu0 }
  0xa1   :  { %v250_v39 = vpop.f32.mrf.mxu1 }
  0xa2   :  { %v251_v40 = vadd.f32 %v250_v39, %v236_v38 }
  0xa7   :  { %v264_v41 = vpop.f32.mrf.mxu2 }
  0xa8   :  { %v278_v42 = vpop.f32.mrf.mxu3  ;;  %v238_v45 = vpop.f32.mrf.mxu0 }
  0xa9   :  { %v279_v43 = vadd.f32 %v278_v42, %v264_v41  ;;  %v252_v46 = vpop.f32.mrf.mxu1 }
  0xaa   :  { %v253_v49 = vadd.f32 %v252_v46, %v238_v45 }
  0xab   :  { %v298_v44 = vpack.c.bf16 %v279_v43, %v251_v40 }
  0xad   :  { %300 = vst [vmem:[%s703_s2] sm:$0xff] %v298_v44 }
  0xaf   :  { %v266_v47 = vpop.f32.mrf.mxu2 }
  0xb0   :  { %v280_v48 = vpop.f32.mrf.mxu3 }
  0xb1   :  { %v281_v50 = vadd.f32 %v280_v48, %v266_v47 }
  0xb3   :  { %v299_v51 = vpack.c.bf16 %v281_v50, %v253_v49 }
  0xb5   :  { %301 = vst [vmem:[%s703_s2 + $0x8] sm:$0xff] %v299_v51 }

// kernel: modified_model_forward.3
= control target key start
LH: loop header
LB: loop body
LE: loop exit
PB: predicated region body
PF: predicated region fallthrough
CT: control target
= control target key end

     0   :  { %9 = vsyncpa [#allocation4], 0  ;;  %s558_s18 = smov [#allocation3]   ;;  %s559_s20 = smov 128   ;;  %s620_s0 = inlined_call_operand.vmem [shape: bf16[16,256], index: 0, kind: input, shape index: {}, may-alias: {0,3}]   ;;  %s621_s1 = inlined_call_operand.vmem [shape: s32[16,1], index: 1, kind: input, shape index: {}]   ;;  %s622_s2 = inlined_call_operand.hbm [shape: bf16[256,256], index: 2, kind: input, shape index: {}]   ;;  %s623_s3 = inlined_call_operand.vmem [shape: bf16[16,256], index: 3, kind: input, shape index: {}, may-alias: {0,3}]   ;;  %s624_s4 = inlined_call_operand.vmem [shape: bf16[16,256], index: 4, kind: output, shape index: {}]  }
   0x1   :  { %s18_s17 = sshll.u32 %s622_s2, 4  ;;  %s20_s19 = sshll.u32 %s558_s18, 4  ;;  %s19_s17 = int_to_ptr.hbm [resolvable:$true] %s18_s17  ;;  %s21_s19 = int_to_ptr.vmem [resolvable:$true] %s20_s19 }
   0x2   :  { %s560_s21 = smov 8  }
   0x3   :  { %26 = dma.hbm_to_vmem [thread:$0]  %s19_s17, 4096, %s21_s19, [#allocation4], %s559_s20, %s559_s20, %s560_s21  }
   0x4   :  { %556 = dma.done.wait [#allocation4], 4096  }
   0x5   :  { %557 = vsyncadd [#allocation4], 4294963200  ;;  %v423_v0 = vld [vmem:[#allocation3 + $0x70] sm:$0xf]  ;;  %v510_v1 = vld [vmem:[#allocation3 + $0x74] sm:$0xf0] }
   0x6   :  { %v509_v2 = vld [vmem:[#allocation3 + $0x74] sm:$0xf]  ;;  %v424_v3 = vor.u32 %v510_v1, %v423_v0  ;;  %v425_v4 = vld [vmem:[#allocation3 + $0x78] sm:$0xf0]  ;;  %v487_v5 = vld [vmem:[#allocation3 + $0xf0] sm:$0xf] }
   0x7   :  { %v526_v6 = vld [vmem:[#allocation3 + $0xf4] sm:$0xf0]  ;;  %v428_v7 = vor.u32 %v509_v2, %v425_v4  ;;  %v525_v9 = vld [vmem:[#allocation3 + $0xf4] sm:$0xf]  ;;  %v489_v10 = vld [vmem:[#allocation3 + $0xf8] sm:$0xf0] }
   0x8   :  { %v488_v8 = vor.u32 %v526_v6, %v487_v5  ;;  %249 = vmatpush.bf16.xpose.msra.mxu0 %v424_v3  ;;  %v492_v11 = vor.u32 %v525_v9, %v489_v10  ;;  %v415_v12 = vld [vmem:[#allocation3 + $0x60] sm:$0xf]  ;;  %v508_v13 = vld [vmem:[#allocation3 + $0x64] sm:$0xf0]  ;;  %v507_v14 = vld [vmem:[#allocation3 + $0x64] sm:$0xf] }
   0x9   :  { %263 = vmatpush.bf16.xpose.msra.mxu1 %v428_v7  ;;  %v417_v15 = vld [vmem:[#allocation3 + $0x68] sm:$0xf0]  ;;  %v479_v16 = vld [vmem:[#allocation3 + $0xe0] sm:$0xf]  ;;  %v524_v17 = vld [vmem:[#allocation3 + $0xe4] sm:$0xf0]  ;;  %v416_v20 = vor.u32 %v508_v13, %v415_v12 }
   0xa   :  { %277 = vmatpush.bf16.xpose.msra.mxu2 %v488_v8  ;;  %291 = vmatpush.bf16.xpose.msra.mxu3 %v492_v11  ;;  %v523_v18 = vld [vmem:[#allocation3 + $0xe4] sm:$0xf]  ;;  %v481_v19 = vld [vmem:[#allocation3 + $0xe8] sm:$0xf0]  ;;  %v420_v21 = vor.u32 %v507_v14, %v417_v15  ;;  %v480_v22 = vor.u32 %v524_v17, %v479_v16  ;;  %v407_v24 = vld [vmem:[#allocation3 + $0x50] sm:$0xf] }
   0xb   :  { %v484_v23 = vor.u32 %v523_v18, %v481_v19  ;;  %v506_v25 = vld [vmem:[#allocation3 + $0x54] sm:$0xf0]  ;;  %v505_v26 = vld [vmem:[#allocation3 + $0x54] sm:$0xf]  ;;  %v409_v27 = vld [vmem:[#allocation3 + $0x58] sm:$0xf0] }
   0xc   :  { %v471_v28 = vld [vmem:[#allocation3 + $0xd0] sm:$0xf]  ;;  %v522_v29 = vld [vmem:[#allocation3 + $0xd4] sm:$0xf0]  ;;  %v521_v30 = vld [vmem:[#allocation3 + $0xd4] sm:$0xf]  ;;  %v408_v32 = vor.u32 %v506_v25, %v407_v24  ;;  %v412_v33 = vor.u32 %v505_v26, %v409_v27 }
   0xd   :  { %v473_v31 = vld [vmem:[#allocation3 + $0xd8] sm:$0xf0]  ;;  %v472_v34 = vor.u32 %v522_v29, %v471_v28  ;;  %v399_v36 = vld [vmem:[#allocation3 + $0x40] sm:$0xf]  ;;  %v504_v37 = vld [vmem:[#allocation3 + $0x44] sm:$0xf0] }
   0xe   :  { %v476_v35 = vor.u32 %v521_v30, %v473_v31  ;;  %v503_v38 = vld [vmem:[#allocation3 + $0x44] sm:$0xf]  ;;  %v401_v39 = vld [vmem:[#allocation3 + $0x48] sm:$0xf0]  ;;  %v463_v40 = vld [vmem:[#allocation3 + $0xc0] sm:$0xf]  ;;  %v400_v44 = vor.u32 %v504_v37, %v399_v36 }
   0xf   :  { %v520_v41 = vld [vmem:[#allocation3 + $0xc4] sm:$0xf0]  ;;  %v519_v42 = vld [vmem:[#allocation3 + $0xc4] sm:$0xf]  ;;  %v465_v43 = vld [vmem:[#allocation3 + $0xc8] sm:$0xf0]  ;;  %v404_v45 = vor.u32 %v503_v38, %v401_v39 }
  0x10   :  { %250 = vmatpush.bf16.xpose.msra.mxu0 %v416_v20  ;;  %v464_v46 = vor.u32 %v520_v41, %v463_v40  ;;  %v468_v47 = vor.u32 %v519_v42, %v465_v43  ;;  %v391_v48 = vld [vmem:[#allocation3 + $0x30] sm:$0xf]  ;;  %v502_v49 = vld [vmem:[#allocation3 + $0x34] sm:$0xf0]  ;;  %v501_v50 = vld [vmem:[#allocation3 + $0x34] sm:$0xf] }
  0x11   :  { %264 = vmatpush.bf16.xpose.msra.mxu1 %v420_v21  ;;  %v393_v51 = vld [vmem:[#allocation3 + $0x38] sm:$0xf0]  ;;  %v455_v52 = vld [vmem:[#allocation3 + $0xb0] sm:$0xf]  ;;  %v518_v53 = vld [vmem:[#allocation3 + $0xb4] sm:$0xf0]  ;;  %v392_v56 = vor.u32 %v502_v49, %v391_v48 }
  0x12   :  { %278 = vmatpush.bf16.xpose.msra.mxu2 %v480_v22  ;;  %292 = vmatpush.bf16.xpose.msra.mxu3 %v484_v23  ;;  %v517_v54 = vld [vmem:[#allocation3 + $0xb4] sm:$0xf]  ;;  %v457_v55 = vld [vmem:[#allocation3 + $0xb8] sm:$0xf0]  ;;  %v396_v57 = vor.u32 %v501_v50, %v393_v51  ;;  %v456_v58 = vor.u32 %v518_v53, %v455_v52  ;;  %v383_v60 = vld [vmem:[#allocation3 + $0x20] sm:$0xf] }
  0x13   :  { %v460_v59 = vor.u32 %v517_v54, %v457_v55  ;;  %v500_v61 = vld [vmem:[#allocation3 + $0x24] sm:$0xf0]  ;;  %v499_v62 = vld [vmem:[#allocation3 + $0x24] sm:$0xf]  ;;  %v385_v63 = vld [vmem:[#allocation3 + $0x28] sm:$0xf0] }
  0x14   :  { %v316_v0 = vld [vmem:[%s621_s1] sm:$0xff]  ;;  %v516_v2 = vld [vmem:[#allocation3 + $0xa4] sm:$0xf0]  ;;  %v561_v3 = vmov 0   ;;  %v449_v5 = vld [vmem:[#allocation3 + $0xa8] sm:$0xf0]  ;;  %v384_v8 = vor.u32 %v500_v61, %v383_v60  ;;  %v388_v9 = vor.u32 %v499_v62, %v385_v63 }
  0x15   :  { %v447_v1 = vld [vmem:[#allocation3 + $0xa0] sm:$0xf]  ;;  %531 = vset.pattern.permute.xlu0 %v561_v3  ;;  %vm318_vm0 = vcmp.ge.s32.totalorder %v316_v0, 448  ;;  %v515_v4 = vld [vmem:[#allocation3 + $0xa4] sm:$0xf]  ;;  %v317_v7 = vld [vmem:[%s621_s1 + $0x8] sm:$0xff] }
  0x16   :  { %v330_v6 = vsel %vm318_vm0, 1, %v561_v3  ;;  %v448_v10 = vor.u32 %v516_v2, %v447_v1  ;;  %v452_v11 = vor.u32 %v515_v4, %v449_v5  ;;  %vm319_vm1 = vcmp.ge.s32.totalorder %v317_v7, 448  ;;  %v375_v12 = vld [vmem:[#allocation3 + $0x10] sm:$0xf]  ;;  %v498_v13 = vld [vmem:[#allocation3 + $0x14] sm:$0xf0] }
  0x17   :  { %333 = vperm.xlu0 %531, %v330_v6   ;;  %v497_v14 = vld [vmem:[#allocation3 + $0x14] sm:$0xf]  ;;  %v331_v15 = vsel %vm319_vm1, 1, %v561_v3  ;;  %v377_v16 = vld [vmem:[#allocation3 + $0x18] sm:$0xf0]  ;;  %v376_v21 = vor.u32 %v498_v13, %v375_v12  ;;  %v321_v61 = vld [vmem:[%s623_s3 + $0x8] sm:$0xff] }
  0x18   :  { %251 = vmatpush.bf16.xpose.msra.mxu0 %v408_v32  ;;  %v439_v17 = vld [vmem:[#allocation3 + $0x90] sm:$0xf]  ;;  %v514_v18 = vld [vmem:[#allocation3 + $0x94] sm:$0xf0]  ;;  %v513_v19 = vld [vmem:[#allocation3 + $0x94] sm:$0xf]  ;;  %v380_v22 = vor.u32 %v497_v14, %v377_v16  ;;  %v324_v0 = vunpack.c.l.bf16 %v321_v61  ;;  %v325_v2 = vunpack.c.h.bf16 %v321_v61 }
  0x19   :  { %265 = vmatpush.bf16.xpose.msra.mxu1 %v412_v33  ;;  %v441_v20 = vld [vmem:[#allocation3 + $0x98] sm:$0xf0]  ;;  %v440_v23 = vor.u32 %v514_v18, %v439_v17  ;;  %v367_v25 = vld [vmem:[#allocation3] sm:$0xf]  ;;  %v496_v26 = vld [vmem:[#allocation3 + $0x4] sm:$0xf0] }
  0x1a   :  { %279 = vmatpush.bf16.xpose.msra.mxu2 %v472_v34  ;;  %293 = vmatpush.bf16.xpose.msra.mxu3 %v476_v35  ;;  %v444_v24 = vor.u32 %v513_v19, %v441_v20  ;;  %v495_v27 = vld [vmem:[#allocation3 + $0x4] sm:$0xf]  ;;  %v369_v28 = vld [vmem:[#allocation3 + $0x8] sm:$0xf0]  ;;  %v431_v29 = vld [vmem:[#allocation3 + $0x80] sm:$0xf]  ;;  %v368_v33 = vor.u32 %v496_v26, %v367_v25 }
  0x1b   :  { %v512_v30 = vld [vmem:[#allocation3 + $0x84] sm:$0xf0]  ;;  %v511_v31 = vld [vmem:[#allocation3 + $0x84] sm:$0xf]  ;;  %v433_v32 = vld [vmem:[#allocation3 + $0x88] sm:$0xf0]  ;;  %v372_v34 = vor.u32 %v495_v27, %v369_v28 }
  0x1c   :  { %v432_v35 = vor.u32 %v512_v30, %v431_v29  ;;  %v436_v36 = vor.u32 %v511_v31, %v433_v32  ;;  %v359_v37 = vld [vmem:[%s620_s0] sm:$0xf]  ;;  %v494_v38 = vld [vmem:[%s620_s0 + $0x4] sm:$0xf0]  ;;  %v493_v39 = vld [vmem:[%s620_s0 + $0x4] sm:$0xf] }
  0x1d   :  { %v361_v40 = vld [vmem:[%s620_s0 + $0x8] sm:$0xf0]  ;;  %v360_v41 = vor.u32 %v494_v38, %v359_v37 }
  0x1e   :  { %v364_v42 = vor.u32 %v493_v39, %v361_v40 }
  0x1f   :  { %336 = vperm.xlu0 %531, %v331_v15  }
  0x20   :  { %252 = vmatpush.bf16.xpose.msra.mxu0 %v400_v44 }
  0x21   :  { %266 = vmatpush.bf16.xpose.msra.mxu1 %v404_v45 }
  0x22   :  { %280 = vmatpush.bf16.xpose.msra.mxu2 %v464_v46  ;;  %294 = vmatpush.bf16.xpose.msra.mxu3 %v468_v47  ;;  %v320_v47 = vld [vmem:[%s623_s3] sm:$0xff] }
  0x23   :  { %v322_v48 = vunpack.c.l.bf16 %v320_v47  ;;  %v323_v52 = vunpack.c.h.bf16 %v320_v47 }
  0x28   :  { %253 = vmatpush.bf16.xpose.msra.mxu0 %v392_v56 }
  0x29   :  { %267 = vmatpush.bf16.xpose.msra.mxu1 %v396_v57 }
  0x2a   :  { %281 = vmatpush.bf16.xpose.msra.mxu2 %v456_v58  ;;  %295 = vmatpush.bf16.xpose.msra.mxu3 %v460_v59 }
  0x30   :  { %254 = vmatpush.bf16.xpose.msra.mxu0 %v384_v8 }
  0x31   :  { %268 = vmatpush.bf16.xpose.msra.mxu1 %v388_v9 }
  0x32   :  { %282 = vmatpush.bf16.xpose.msra.mxu2 %v448_v10  ;;  %296 = vmatpush.bf16.xpose.msra.mxu3 %v452_v11 }
  0x38   :  { %255 = vmatpush.bf16.xpose.msra.mxu0 %v376_v21 }
  0x39   :  { %269 = vmatpush.bf16.xpose.msra.mxu1 %v380_v22 }
  0x3a   :  { %283 = vmatpush.bf16.xpose.msra.mxu2 %v440_v23  ;;  %297 = vmatpush.bf16.xpose.msra.mxu3 %v444_v24 }
  0x40   :  { %256 = vmatpush.bf16.xpose.msra.mxu0 %v368_v33 }
  0x41   :  { %270 = vmatpush.bf16.xpose.msra.mxu1 %v372_v34 }
  0x42   :  { %284 = vmatpush.bf16.xpose.msra.mxu2 %v432_v35  ;;  %298 = vmatpush.bf16.xpose.msra.mxu3 %v436_v36 }
  0x47   :  { %257 = vmatmul.bf16.vlgmr.msra.gmra.mxu0 %v360_v41 }
  0x48   :  { %271 = vmatmul.bf16.vlgmr.msra.gmra.mxu1 %v364_v42 }
  0x49   :  { %285 = vmatmul.bf16.vlgmr.msra.gmra.mxu2 %v360_v41  ;;  %299 = vmatmul.bf16.vlgmr.msra.gmra.mxu3 %v364_v42 }
  0x89   :  { %v334_v45 = vpop.permute.xlu0 %333 }
  0x8a   :  { %vm338_vm2 = vcmp.eq.s32.totalorder %v334_v45, 1 }
  0x91   :  { %v337_v59 = vpop.permute.xlu0 %336 }
  0x92   :  { %vm339_vm3 = vcmp.eq.s32.totalorder %v337_v59, 1 }
  0xc4   :  { %v258_v43 = vpop.f32.mrf.mxu0 }
  0xc5   :  { %v272_v44 = vpop.f32.mrf.mxu1 }
  0xc6   :  { %v273_v46 = vadd.f32 %v272_v44, %v258_v43 }
  0xc8   :  { %v340_v49 = vsel %vm338_vm2, %v273_v46, 0.0 }
  0xc9   :  { %v344_v54 = vadd.f32 %v340_v49, %v322_v48 }
  0xcc   :  { %v286_v50 = vpop.f32.mrf.mxu2  ;;  %v300_v51 = vpop.f32.mrf.mxu3 }
  0xcd   :  { %v301_v53 = vadd.f32 %v300_v51, %v286_v50  ;;  %v260_v55 = vpop.f32.mrf.mxu0  ;;  %v274_v56 = vpop.f32.mrf.mxu1 }
  0xce   :  { %v275_v60 = vadd.f32 %v274_v56, %v260_v55 }
  0xcf   :  { %v341_v57 = vsel %vm338_vm2, %v301_v53, 0.0 }
  0xd0   :  { %v345_v58 = vadd.f32 %v341_v57, %v323_v52  ;;  %v342_v3 = vsel %vm339_vm3, %v275_v60, 0.0 }
  0xd1   :  { %v346_v6 = vadd.f32 %v342_v3, %v324_v0 }
  0xd2   :  { %v348_v62 = vpack.c.bf16 %v345_v58, %v344_v54 }
  0xd4   :  { %v288_v63 = vpop.f32.mrf.mxu2  ;;  %350 = vst [vmem:[%s624_s4] sm:$0xff] %v348_v62  ;;  %v302_v1 = vpop.f32.mrf.mxu3 }
  0xd5   :  { %v303_v4 = vadd.f32 %v302_v1, %v288_v63 }
  0xd7   :  { %v343_v5 = vsel %vm339_vm3, %v303_v4, 0.0 }
  0xd8   :  { %v347_v7 = vadd.f32 %v343_v5, %v325_v2 }
  0xda   :  { %v349_v8 = vpack.c.bf16 %v347_v7, %v346_v6 }
  0xdc   :  { %351 = vst [vmem:[%s624_s4 + $0x8] sm:$0xff] %v349_v8 }
  0xdd   :  { %356 = vsyncpa [#allocation4], 1 }

// kernel: modified_model_forward.5
= control target key start
LH: loop header
LB: loop body
LE: loop exit
PB: predicated region body
PF: predicated region fallthrough
CT: control target
= control target key end

     0   :  { %11 = vsyncpa [#allocation7], 0  ;;  %s2830_s0 = inlined_call_operand.vmem [shape: bf16[16,256], index: 0, kind: input, shape index: {}]   ;;  %s2831_s1 = inlined_call_operand.vmem [shape: bf16[16,256], index: 1, kind: input, shape index: {}]   ;;  %s2832_s2 = inlined_call_operand.hbm [shape: bf16[256,640], index: 2, kind: input, shape index: {}]   ;;  %s2833_s3 = inlined_call_operand.vmem [shape: s32[16,1], index: 3, kind: input, shape index: {}]   ;;  %s2834_s4 = inlined_call_operand.hbm [shape: bf16[16,640], index: 4, kind: output, shape index: {0}]   ;;  %s2835_s5 = inlined_call_operand.vmem [shape: f32[16,1], index: 5, kind: output, shape index: {1}]  }
   0x1   :  { %12 = vsyncpa [#allocation8], 0  ;;  %s21_s20 = sshll.u32 %s2832_s2, 4  ;;  %s2583_s21 = smov [#allocation6]   ;;  %s22_s20 = int_to_ptr.hbm [resolvable:$true] %s21_s20 }
   0x2   :  { %s23_s22 = sshll.u32 %s2583_s21, 4  ;;  %s2584_s23 = smov 320   ;;  %s24_s22 = int_to_ptr.vmem [resolvable:$true] %s23_s22 }
   0x3   :  { %s2585_s24 = smov 20  }
   0x4   :  { %29 = dma.hbm_to_vmem [thread:$0]  %s22_s20, 10240, %s24_s22, [#allocation7], %s2584_s23, %s2584_s23, %s2585_s24  }
   0x5   :  { %2579 = dma.done.wait [#allocation7], 10240  }
   0x6   :  { %2580 = vsyncadd [#allocation7], 4294957056  ;;  %v1821_v0 = vld [vmem:[#allocation6 + $0x118] sm:$0xf]  ;;  %v2366_v1 = vld [vmem:[#allocation6 + $0x128] sm:$0xf0] }
   0x7   :  { %v1981_v2 = vld [vmem:[#allocation6 + $0x258] sm:$0xf]  ;;  %v1822_v3 = vor.u32 %v2366_v1, %v1821_v0  ;;  %v2406_v4 = vld [vmem:[#allocation6 + $0x268] sm:$0xf0]  ;;  %v2364_v5 = vld [vmem:[#allocation6 + $0x11c] sm:$0xf] }
   0x8   :  { %v1823_v6 = vld [vmem:[#allocation6 + $0x12c] sm:$0xf0]  ;;  %v1982_v7 = vor.u32 %v2406_v4, %v1981_v2  ;;  %v2404_v9 = vld [vmem:[#allocation6 + $0x25c] sm:$0xf]  ;;  %v2361_v13 = vld [vmem:[#allocation6 + $0x100] sm:$0xf0] }
   0x9   :  { %v1826_v8 = vor.u32 %v2364_v5, %v1823_v6  ;;  %v1983_v10 = vld [vmem:[#allocation6 + $0x26c] sm:$0xf0]  ;;  %573 = vmatpush.bf16.msra.mxu0 %v1822_v3  ;;  %v2401_v15 = vld [vmem:[#allocation6 + $0x240] sm:$0xf0]  ;;  %v2359_v18 = vld [vmem:[#allocation6 + $0xf4] sm:$0xf] }
   0xa   :  { %v1801_v11 = vld [vmem:[#allocation6 + $0xf0] sm:$0xf]  ;;  %v1986_v12 = vor.u32 %v2404_v9, %v1983_v10  ;;  %587 = vmatpush.bf16.msra.mxu1 %v1982_v7  ;;  %v1803_v19 = vld [vmem:[#allocation6 + $0x104] sm:$0xf0]  ;;  %v2399_v20 = vld [vmem:[#allocation6 + $0x234] sm:$0xf] }
   0xb   :  { %v1961_v14 = vld [vmem:[#allocation6 + $0x230] sm:$0xf]  ;;  %601 = vmatpush.bf16.msra.mxu2 %v1826_v8  ;;  %v1802_v16 = vor.u32 %v2361_v13, %v1801_v11  ;;  %v1806_v21 = vor.u32 %v2359_v18, %v1803_v19  ;;  %v1963_v22 = vld [vmem:[#allocation6 + $0x244] sm:$0xf0]  ;;  %v2356_v24 = vld [vmem:[#allocation6 + $0xd8] sm:$0xf0] }
   0xc   :  { %v1962_v17 = vor.u32 %v2401_v15, %v1961_v14  ;;  %615 = vmatpush.bf16.msra.mxu3 %v1986_v12  ;;  %v1781_v23 = vld [vmem:[#allocation6 + $0xc8] sm:$0xf]  ;;  %v1966_v25 = vor.u32 %v2399_v20, %v1963_v22  ;;  %v2396_v27 = vld [vmem:[#allocation6 + $0x218] sm:$0xf0]  ;;  %v2354_v28 = vld [vmem:[#allocation6 + $0xcc] sm:$0xf] }
   0xd   :  { %v1941_v26 = vld [vmem:[#allocation6 + $0x208] sm:$0xf]  ;;  %574 = vmatpush.bf16.msra.mxu0 %v1802_v16  ;;  %v1782_v29 = vor.u32 %v2356_v24, %v1781_v23  ;;  %v1783_v30 = vld [vmem:[#allocation6 + $0xdc] sm:$0xf0]  ;;  %v2394_v31 = vld [vmem:[#allocation6 + $0x20c] sm:$0xf] }
   0xe   :  { %v1943_v32 = vld [vmem:[#allocation6 + $0x21c] sm:$0xf0]  ;;  %588 = vmatpush.bf16.msra.mxu1 %v1962_v17  ;;  %v1942_v33 = vor.u32 %v2396_v27, %v1941_v26  ;;  %v1786_v34 = vor.u32 %v2354_v28, %v1783_v30  ;;  %v2351_v36 = vld [vmem:[#allocation6 + $0xb0] sm:$0xf0]  ;;  %v2349_v40 = vld [vmem:[#allocation6 + $0xa4] sm:$0xf] }
   0xf   :  { %602 = vmatpush.bf16.msra.mxu2 %v1806_v21  ;;  %v1761_v35 = vld [vmem:[#allocation6 + $0xa0] sm:$0xf]  ;;  %v1946_v38 = vor.u32 %v2394_v31, %v1943_v32  ;;  %v2391_v39 = vld [vmem:[#allocation6 + $0x1f0] sm:$0xf0]  ;;  %v1763_v41 = vld [vmem:[#allocation6 + $0xb4] sm:$0xf0] }
  0x10   :  { %v1921_v37 = vld [vmem:[#allocation6 + $0x1e0] sm:$0xf]  ;;  %616 = vmatpush.bf16.msra.mxu3 %v1966_v25  ;;  %v2389_v42 = vld [vmem:[#allocation6 + $0x1e4] sm:$0xf]  ;;  %v1923_v43 = vld [vmem:[#allocation6 + $0x1f4] sm:$0xf0]  ;;  %v1762_v44 = vor.u32 %v2351_v36, %v1761_v35  ;;  %v1766_v46 = vor.u32 %v2349_v40, %v1763_v41 }
  0x11   :  { %575 = vmatpush.bf16.msra.mxu0 %v1782_v29  ;;  %v1922_v45 = vor.u32 %v2391_v39, %v1921_v37  ;;  %v1741_v47 = vld [vmem:[#allocation6 + $0x78] sm:$0xf]  ;;  %v2346_v48 = vld [vmem:[#allocation6 + $0x88] sm:$0xf0]  ;;  %v1926_v50 = vor.u32 %v2389_v42, %v1923_v43  ;;  %v2344_v52 = vld [vmem:[#allocation6 + $0x7c] sm:$0xf] }
  0x12   :  { %589 = vmatpush.bf16.msra.mxu1 %v1942_v33  ;;  %v1901_v49 = vld [vmem:[#allocation6 + $0x1b8] sm:$0xf]  ;;  %v2386_v51 = vld [vmem:[#allocation6 + $0x1c8] sm:$0xf0]  ;;  %v1743_v53 = vld [vmem:[#allocation6 + $0x8c] sm:$0xf0]  ;;  %v1742_v56 = vor.u32 %v2346_v48, %v1741_v47 }
  0x13   :  { %603 = vmatpush.bf16.msra.mxu2 %v1786_v34  ;;  %v2384_v54 = vld [vmem:[#allocation6 + $0x1bc] sm:$0xf]  ;;  %v1903_v55 = vld [vmem:[#allocation6 + $0x1cc] sm:$0xf0]  ;;  %v1902_v57 = vor.u32 %v2386_v51, %v1901_v49  ;;  %v1746_v58 = vor.u32 %v2344_v52, %v1743_v53  ;;  %v2341_v60 = vld [vmem:[#allocation6 + $0x60] sm:$0xf0] }
  0x14   :  { %617 = vmatpush.bf16.msra.mxu3 %v1946_v38  ;;  %v1721_v59 = vld [vmem:[#allocation6 + $0x50] sm:$0xf]  ;;  %v1906_v62 = vor.u32 %v2384_v54, %v1903_v55  ;;  %v2381_v63 = vld [vmem:[#allocation6 + $0x1a0] sm:$0xf0]  ;;  %v2339_v0 = vld [vmem:[#allocation6 + $0x54] sm:$0xf] }
  0x15   :  { %576 = vmatpush.bf16.msra.mxu0 %v1762_v44  ;;  %v1881_v61 = vld [vmem:[#allocation6 + $0x190] sm:$0xf]  ;;  %v1723_v1 = vld [vmem:[#allocation6 + $0x64] sm:$0xf0]  ;;  %v2379_v2 = vld [vmem:[#allocation6 + $0x194] sm:$0xf]  ;;  %v1722_v4 = vor.u32 %v2341_v60, %v1721_v59 }
  0x16   :  { %590 = vmatpush.bf16.msra.mxu1 %v1922_v45  ;;  %v1883_v3 = vld [vmem:[#allocation6 + $0x1a4] sm:$0xf0]  ;;  %v1882_v5 = vor.u32 %v2381_v63, %v1881_v61  ;;  %v1726_v6 = vor.u32 %v2339_v0, %v1723_v1  ;;  %v2336_v8 = vld [vmem:[#allocation6 + $0x38] sm:$0xf0]  ;;  %v2334_v12 = vld [vmem:[#allocation6 + $0x2c] sm:$0xf] }
  0x17   :  { %604 = vmatpush.bf16.msra.mxu2 %v1766_v46  ;;  %v1701_v7 = vld [vmem:[#allocation6 + $0x28] sm:$0xf]  ;;  %v1886_v10 = vor.u32 %v2379_v2, %v1883_v3  ;;  %v2376_v11 = vld [vmem:[#allocation6 + $0x178] sm:$0xf0]  ;;  %v1703_v13 = vld [vmem:[#allocation6 + $0x3c] sm:$0xf0] }
  0x18   :  { %618 = vmatpush.bf16.msra.mxu3 %v1926_v50  ;;  %v1861_v9 = vld [vmem:[#allocation6 + $0x168] sm:$0xf]  ;;  %v2374_v14 = vld [vmem:[#allocation6 + $0x16c] sm:$0xf]  ;;  %v1863_v15 = vld [vmem:[#allocation6 + $0x17c] sm:$0xf0]  ;;  %v1702_v16 = vor.u32 %v2336_v8, %v1701_v7  ;;  %v1706_v20 = vor.u32 %v2334_v12, %v1703_v13 }
  0x19   :  { %577 = vmatpush.bf16.msra.mxu0 %v1742_v56  ;;  %v1681_v17 = vld [vmem:[#allocation6] sm:$0xf]  ;;  %v2331_v18 = vld [vmem:[#allocation6 + $0x10] sm:$0xf0]  ;;  %v1862_v19 = vor.u32 %v2376_v11, %v1861_v9  ;;  %v2329_v23 = vld [vmem:[#allocation6 + $0x4] sm:$0xf]  ;;  %v1866_v24 = vor.u32 %v2374_v14, %v1863_v15 }
  0x1a   :  { %591 = vmatpush.bf16.msra.mxu1 %v1902_v57  ;;  %v1841_v21 = vld [vmem:[#allocation6 + $0x140] sm:$0xf]  ;;  %v2371_v22 = vld [vmem:[#allocation6 + $0x150] sm:$0xf0]  ;;  %v1683_v25 = vld [vmem:[#allocation6 + $0x14] sm:$0xf0]  ;;  %v1682_v31 = vor.u32 %v2331_v18, %v1681_v17 }
  0x1b   :  { %605 = vmatpush.bf16.msra.mxu2 %v1746_v58  ;;  %v2369_v26 = vld [vmem:[#allocation6 + $0x144] sm:$0xf]  ;;  %v1843_v27 = vld [vmem:[#allocation6 + $0x154] sm:$0xf0]  ;;  %v1829_v28 = vld [vmem:[#allocation6 + $0x120] sm:$0xf]  ;;  %v1842_v35 = vor.u32 %v2371_v22, %v1841_v21  ;;  %v1686_v36 = vor.u32 %v2329_v23, %v1683_v25 }
  0x1c   :  { %619 = vmatpush.bf16.msra.mxu3 %v1906_v62  ;;  %v2367_v29 = vld [vmem:[#allocation6 + $0x130] sm:$0xf0]  ;;  %v1989_v30 = vld [vmem:[#allocation6 + $0x260] sm:$0xf]  ;;  %v2365_v33 = vld [vmem:[#allocation6 + $0x124] sm:$0xf]  ;;  %v1846_v39 = vor.u32 %v2369_v26, %v1843_v27 }
  0x1d   :  { %578 = vmatpush.bf16.msra.mxu0 %v1722_v4  ;;  %v2407_v32 = vld [vmem:[#allocation6 + $0x270] sm:$0xf0]  ;;  %v1831_v34 = vld [vmem:[#allocation6 + $0x134] sm:$0xf0]  ;;  %v2405_v37 = vld [vmem:[#allocation6 + $0x264] sm:$0xf]  ;;  %v1830_v40 = vor.u32 %v2367_v29, %v1829_v28 }
  0x1e   :  { %592 = vmatpush.bf16.msra.mxu1 %v1882_v5  ;;  %v1991_v38 = vld [vmem:[#allocation6 + $0x274] sm:$0xf0]  ;;  %v2362_v42 = vld [vmem:[#allocation6 + $0x108] sm:$0xf0]  ;;  %v1990_v43 = vor.u32 %v2407_v32, %v1989_v30  ;;  %v1834_v44 = vor.u32 %v2365_v33, %v1831_v34  ;;  %v2360_v47 = vld [vmem:[#allocation6 + $0xfc] sm:$0xf] }
  0x1f   :  { %606 = vmatpush.bf16.msra.mxu2 %v1726_v6  ;;  %v1809_v41 = vld [vmem:[#allocation6 + $0xf8] sm:$0xf]  ;;  %v2402_v46 = vld [vmem:[#allocation6 + $0x248] sm:$0xf0]  ;;  %v1994_v48 = vor.u32 %v2405_v37, %v1991_v38  ;;  %v1811_v49 = vld [vmem:[#allocation6 + $0x10c] sm:$0xf0] }
  0x20   :  { %620 = vmatpush.bf16.msra.mxu3 %v1886_v10  ;;  %v1969_v45 = vld [vmem:[#allocation6 + $0x238] sm:$0xf]  ;;  %v2400_v50 = vld [vmem:[#allocation6 + $0x23c] sm:$0xf]  ;;  %v1971_v51 = vld [vmem:[#allocation6 + $0x24c] sm:$0xf0]  ;;  %v1810_v55 = vor.u32 %v2362_v42, %v1809_v41  ;;  %v1814_v59 = vor.u32 %v2360_v47, %v1811_v49 }
  0x21   :  { %579 = vmatpush.bf16.msra.mxu0 %v1702_v16  ;;  %v1673_v52 = vld [vmem:[%s2830_s0] sm:$0xf]  ;;  %v2328_v53 = vld [vmem:[%s2830_s0 + $0x4] sm:$0xf0]  ;;  %v2327_v54 = vld [vmem:[%s2830_s0 + $0x4] sm:$0xf]  ;;  %v1970_v58 = vor.u32 %v2402_v46, %v1969_v45  ;;  %v1974_v0 = vor.u32 %v2400_v50, %v1971_v51 }
  0x22   :  { %593 = vmatpush.bf16.msra.mxu1 %v1862_v19  ;;  %v2635_v56 = vor.u32 %v2328_v53, %v1673_v52  ;;  %v1675_v57 = vld [vmem:[%s2830_s0 + $0x8] sm:$0xf0]  ;;  %v1789_v60 = vld [vmem:[#allocation6 + $0xd0] sm:$0xf]  ;;  %v2357_v61 = vld [vmem:[#allocation6 + $0xe0] sm:$0xf0] }
  0x23   :  { %607 = vmatpush.bf16.msra.mxu2 %v1706_v20  ;;  %v1949_v62 = vld [vmem:[#allocation6 + $0x210] sm:$0xf]  ;;  %v2640_v63 = vor.u32 %v2327_v54, %v1675_v57  ;;  %v2397_v1 = vld [vmem:[#allocation6 + $0x220] sm:$0xf0]  ;;  %v2355_v2 = vld [vmem:[#allocation6 + $0xd4] sm:$0xf]  ;;  %v1790_v6 = vor.u32 %v2357_v61, %v1789_v60 }
  0x24   :  { %621 = vmatpush.bf16.msra.mxu3 %v1866_v24  ;;  %v1791_v3 = vld [vmem:[#allocation6 + $0xe4] sm:$0xf0]  ;;  %v2395_v4 = vld [vmem:[#allocation6 + $0x214] sm:$0xf]  ;;  %v1950_v7 = vor.u32 %v2397_v1, %v1949_v62  ;;  %v2352_v10 = vld [vmem:[#allocation6 + $0xb8] sm:$0xf0] }
  0x25   :  { %580 = vmatpush.bf16.msra.mxu0 %v1682_v31  ;;  %v1951_v5 = vld [vmem:[#allocation6 + $0x224] sm:$0xf0]  ;;  %v1794_v8 = vor.u32 %v2355_v2, %v1791_v3  ;;  %v2392_v13 = vld [vmem:[#allocation6 + $0x1f8] sm:$0xf0]  ;;  %v2350_v14 = vld [vmem:[#allocation6 + $0xac] sm:$0xf] }
  0x26   :  { %594 = vmatpush.bf16.msra.mxu1 %v1842_v35  ;;  %v1769_v9 = vld [vmem:[#allocation6 + $0xa8] sm:$0xf]  ;;  %v1954_v12 = vor.u32 %v2395_v4, %v1951_v5  ;;  %v1771_v15 = vld [vmem:[#allocation6 + $0xbc] sm:$0xf0]  ;;  %v2390_v16 = vld [vmem:[#allocation6 + $0x1ec] sm:$0xf] }
  0x27   :  { %608 = vmatpush.bf16.msra.mxu2 %v1686_v36  ;;  %v1929_v11 = vld [vmem:[#allocation6 + $0x1e8] sm:$0xf]  ;;  %v1931_v17 = vld [vmem:[#allocation6 + $0x1fc] sm:$0xf0]  ;;  %v1770_v18 = vor.u32 %v2352_v10, %v1769_v9  ;;  %v1774_v20 = vor.u32 %v2350_v14, %v1771_v15  ;;  %v2347_v22 = vld [vmem:[#allocation6 + $0x90] sm:$0xf0] }
  0x28   :  { %622 = vmatpush.bf16.msra.mxu3 %v1846_v39  ;;  %581 = vmatmul.bf16.vlgmr.msra.gmra.mxu0 %v2635_v56  ;;  %v1930_v19 = vor.u32 %v2392_v13, %v1929_v11  ;;  %v1749_v21 = vld [vmem:[#allocation6 + $0x80] sm:$0xf]  ;;  %v1934_v24 = vor.u32 %v2390_v16, %v1931_v17  ;;  %v2387_v25 = vld [vmem:[#allocation6 + $0x1d0] sm:$0xf0]  ;;  %v2345_v26 = vld [vmem:[#allocation6 + $0x84] sm:$0xf] }
  0x29   :  { %629 = vmatpush.bf16.msrb.mxu0 %v1830_v40  ;;  %595 = vmatmul.bf16.vlgmr.msra.gmra.mxu1 %v2640_v63  ;;  %v1909_v23 = vld [vmem:[#allocation6 + $0x1c0] sm:$0xf]  ;;  %v1751_v27 = vld [vmem:[#allocation6 + $0x94] sm:$0xf0]  ;;  %v2385_v28 = vld [vmem:[#allocation6 + $0x1c4] sm:$0xf]  ;;  %v1750_v30 = vor.u32 %v2347_v22, %v1749_v21 }
  0x2a   :  { %643 = vmatpush.bf16.msrb.mxu1 %v1990_v43  ;;  %609 = vmatmul.bf16.vlgmr.msra.gmra.mxu2 %v2635_v56  ;;  %v1911_v29 = vld [vmem:[#allocation6 + $0x1d4] sm:$0xf0]  ;;  %v1910_v31 = vor.u32 %v2387_v25, %v1909_v23  ;;  %v1754_v32 = vor.u32 %v2345_v26, %v1751_v27  ;;  %v2342_v34 = vld [vmem:[#allocation6 + $0x68] sm:$0xf0]  ;;  %v2340_v38 = vld [vmem:[#allocation6 + $0x5c] sm:$0xf] }
  0x2b   :  { %657 = vmatpush.bf16.msrb.mxu2 %v1834_v44  ;;  %623 = vmatmul.bf16.vlgmr.msra.gmra.mxu3 %v2640_v63  ;;  %v1729_v33 = vld [vmem:[#allocation6 + $0x58] sm:$0xf]  ;;  %v1914_v36 = vor.u32 %v2385_v28, %v1911_v29  ;;  %v2382_v37 = vld [vmem:[#allocation6 + $0x1a8] sm:$0xf0]  ;;  %v1731_v39 = vld [vmem:[#allocation6 + $0x6c] sm:$0xf0] }
  0x2c   :  { %671 = vmatpush.bf16.msrb.mxu3 %v1994_v48  ;;  %v1889_v35 = vld [vmem:[#allocation6 + $0x198] sm:$0xf]  ;;  %v2380_v40 = vld [vmem:[#allocation6 + $0x19c] sm:$0xf]  ;;  %v1891_v41 = vld [vmem:[#allocation6 + $0x1ac] sm:$0xf0]  ;;  %v1730_v42 = vor.u32 %v2342_v34, %v1729_v33  ;;  %v1734_v44 = vor.u32 %v2340_v38, %v1731_v39 }
  0x2d   :  { %630 = vmatpush.bf16.msrb.mxu0 %v1810_v55  ;;  %v1890_v43 = vor.u32 %v2382_v37, %v1889_v35  ;;  %v1709_v45 = vld [vmem:[#allocation6 + $0x30] sm:$0xf]  ;;  %v2337_v46 = vld [vmem:[#allocation6 + $0x40] sm:$0xf0]  ;;  %v1894_v48 = vor.u32 %v2380_v40, %v1891_v41  ;;  %v2335_v50 = vld [vmem:[#allocation6 + $0x34] sm:$0xf] }
  0x2e   :  { %644 = vmatpush.bf16.msrb.mxu1 %v1970_v58  ;;  %v1869_v47 = vld [vmem:[#allocation6 + $0x170] sm:$0xf]  ;;  %v2377_v49 = vld [vmem:[#allocation6 + $0x180] sm:$0xf0]  ;;  %v1711_v51 = vld [vmem:[#allocation6 + $0x44] sm:$0xf0]  ;;  %v1710_v54 = vor.u32 %v2337_v46, %v1709_v45 }
  0x2f   :  { %658 = vmatpush.bf16.msrb.mxu2 %v1814_v59  ;;  %v2375_v52 = vld [vmem:[#allocation6 + $0x174] sm:$0xf]  ;;  %v1871_v53 = vld [vmem:[#allocation6 + $0x184] sm:$0xf0]  ;;  %v2332_v57 = vld [vmem:[#allocation6 + $0x18] sm:$0xf0]  ;;  %v1870_v58 = vor.u32 %v2377_v49, %v1869_v47  ;;  %v1714_v59 = vor.u32 %v2335_v50, %v1711_v51 }
  0x30   :  { %672 = vmatpush.bf16.msrb.mxu3 %v1974_v0  ;;  %v1689_v55 = vld [vmem:[#allocation6 + $0x8] sm:$0xf]  ;;  %v2372_v61 = vld [vmem:[#allocation6 + $0x158] sm:$0xf0]  ;;  %v2330_v62 = vld [vmem:[#allocation6 + $0xc] sm:$0xf]  ;;  %v1874_v0 = vor.u32 %v2375_v52, %v1871_v53 }
  0x31   :  { %631 = vmatpush.bf16.msrb.mxu0 %v1790_v6  ;;  %v1849_v60 = vld [vmem:[#allocation6 + $0x148] sm:$0xf]  ;;  %v1691_v1 = vld [vmem:[#allocation6 + $0x1c] sm:$0xf0]  ;;  %v2370_v2 = vld [vmem:[#allocation6 + $0x14c] sm:$0xf] }
  0x32   :  { %645 = vmatpush.bf16.msrb.mxu1 %v1950_v7  ;;  %v1851_v3 = vld [vmem:[#allocation6 + $0x15c] sm:$0xf0]  ;;  %v1837_v4 = vld [vmem:[#allocation6 + $0x128] sm:$0xf]  ;;  %v2368_v5 = vld [vmem:[#allocation6 + $0x138] sm:$0xf0]  ;;  %v1690_v7 = vor.u32 %v2332_v57, %v1689_v55  ;;  %v1850_v11 = vor.u32 %v2372_v61, %v1849_v60 }
  0x33   :  { %659 = vmatpush.bf16.msrb.mxu2 %v1794_v8  ;;  %v1997_v6 = vld [vmem:[#allocation6 + $0x268] sm:$0xf]  ;;  %v2408_v8 = vld [vmem:[#allocation6 + $0x278] sm:$0xf0]  ;;  %v2149_v9 = vld [vmem:[#allocation6 + $0x118] sm:$0xf]  ;;  %v1854_v15 = vor.u32 %v2370_v2, %v1851_v3  ;;  %v1838_v16 = vor.u32 %v2368_v5, %v1837_v4 }
  0x34   :  { %673 = vmatpush.bf16.msrb.mxu3 %v1954_v12  ;;  %v2448_v10 = vld [vmem:[#allocation6 + $0x128] sm:$0xf0]  ;;  %v1694_v12 = vor.u32 %v2330_v62, %v1691_v1  ;;  %v2309_v13 = vld [vmem:[#allocation6 + $0x258] sm:$0xf]  ;;  %v1998_v17 = vor.u32 %v2408_v8, %v1997_v6  ;;  %v1977_v21 = vld [vmem:[#allocation6 + $0x240] sm:$0xf] }
  0x35   :  { %632 = vmatpush.bf16.msrb.mxu0 %v1770_v18  ;;  %v2488_v14 = vld [vmem:[#allocation6 + $0x268] sm:$0xf0]  ;;  %v2150_v18 = vor.u32 %v2448_v10, %v2149_v9  ;;  %v2403_v23 = vld [vmem:[#allocation6 + $0x250] sm:$0xf0]  ;;  %v2443_v25 = vld [vmem:[#allocation6 + $0x100] sm:$0xf0] }
  0x36   :  { %646 = vmatpush.bf16.msrb.mxu1 %v1930_v19  ;;  %v1817_v19 = vld [vmem:[#allocation6 + $0x100] sm:$0xf]  ;;  %v2310_v22 = vor.u32 %v2488_v14, %v2309_v13  ;;  %v2289_v26 = vld [vmem:[#allocation6 + $0x230] sm:$0xf]  ;;  %v2483_v27 = vld [vmem:[#allocation6 + $0x240] sm:$0xf0]  ;;  %v1978_v29 = vor.u32 %v2403_v23, %v1977_v21 }
  0x37   :  { %660 = vmatpush.bf16.msrb.mxu2 %v1774_v20  ;;  %v2363_v20 = vld [vmem:[#allocation6 + $0x110] sm:$0xf0]  ;;  %v1957_v33 = vld [vmem:[#allocation6 + $0x218] sm:$0xf]  ;;  %v2290_v34 = vor.u32 %v2483_v27, %v2289_v26  ;;  %v2398_v35 = vld [vmem:[#allocation6 + $0x228] sm:$0xf0] }
  0x38   :  { %674 = vmatpush.bf16.msrb.mxu3 %v1934_v24  ;;  %v2129_v24 = vld [vmem:[#allocation6 + $0xf0] sm:$0xf]  ;;  %v1818_v28 = vor.u32 %v2363_v20, %v1817_v19  ;;  %v2438_v37 = vld [vmem:[#allocation6 + $0xd8] sm:$0xf0]  ;;  %v2269_v38 = vld [vmem:[#allocation6 + $0x208] sm:$0xf] }
  0x39   :  { %633 = vmatpush.bf16.msrb.mxu0 %v1750_v30  ;;  %v2130_v30 = vor.u32 %v2443_v25, %v2129_v24  ;;  %v2478_v39 = vld [vmem:[#allocation6 + $0x218] sm:$0xf0]  ;;  %v1777_v41 = vld [vmem:[#allocation6 + $0xb0] sm:$0xf]  ;;  %v2089_v49 = vld [vmem:[#allocation6 + $0xa0] sm:$0xf] }
  0x3a   :  { %647 = vmatpush.bf16.msrb.mxu1 %v1910_v31  ;;  %v1797_v31 = vld [vmem:[#allocation6 + $0xd8] sm:$0xf]  ;;  %v1937_v45 = vld [vmem:[#allocation6 + $0x1f0] sm:$0xf]  ;;  %v2270_v47 = vor.u32 %v2478_v39, %v2269_v38  ;;  %v2433_v50 = vld [vmem:[#allocation6 + $0xb0] sm:$0xf0] }
  0x3b   :  { %661 = vmatpush.bf16.msrb.mxu2 %v1754_v32  ;;  %v2358_v32 = vld [vmem:[#allocation6 + $0xe8] sm:$0xf0]  ;;  %v1579_v46 = vld [vmem:[%s2833_s3] sm:$0xff]  ;;  %v2586_v51 = vmov 0   ;;  %v2249_v52 = vld [vmem:[#allocation6 + $0x1e0] sm:$0xf]  ;;  %v2090_v57 = vor.u32 %v2433_v50, %v2089_v49 }
  0x3c   :  { %675 = vmatpush.bf16.msrb.mxu3 %v1914_v36  ;;  %v2109_v36 = vld [vmem:[#allocation6 + $0xc8] sm:$0xf]  ;;  %v1798_v40 = vor.u32 %v2358_v32, %v1797_v31  ;;  %2499 = vset.pattern.permute.xlu2 %v2586_v51  ;;  %v2473_v53 = vld [vmem:[#allocation6 + $0x1f0] sm:$0xf0]  ;;  %v2388_v62 = vld [vmem:[#allocation6 + $0x1d8] sm:$0xf0] }
  0x3d   :  { %634 = vmatpush.bf16.msrb.mxu0 %v1730_v42  ;;  %v1958_v42 = vor.u32 %v2398_v35, %v1957_v33  ;;  %1582 = vperm.xlu2 %2499, %v1579_v46   ;;  %v1917_v60 = vld [vmem:[#allocation6 + $0x1c8] sm:$0xf]  ;;  %v2250_v61 = vor.u32 %v2473_v53, %v2249_v52  ;;  %v2428_v1 = vld [vmem:[#allocation6 + $0x88] sm:$0xf0]  ;;  %v2229_v2 = vld [vmem:[#allocation6 + $0x1b8] sm:$0xf] }
  0x3e   :  { %648 = vmatpush.bf16.msrb.mxu1 %v1890_v43  ;;  %v2110_v43 = vor.u32 %v2438_v37, %v2109_v36  ;;  %2498 = vset.pattern.permute.xlu1 %v2586_v51  ;;  %v2468_v3 = vld [vmem:[#allocation6 + $0x1c8] sm:$0xf0]  ;;  %v1580_v5 = vld [vmem:[%s2833_s3 + $0x8] sm:$0xff]  ;;  %v1918_v6 = vor.u32 %v2388_v62, %v1917_v60  ;;  %v1737_v8 = vld [vmem:[#allocation6 + $0x60] sm:$0xf]  ;;  %vm1485_vm3 = vcmask 7168  }
  0x3f   :  { %662 = vmatpush.bf16.msrb.mxu2 %v1734_v44  ;;  %v2353_v44 = vld [vmem:[#allocation6 + $0xc0] sm:$0xf0]  ;;  %2500 = vset.pattern.permute.xlu0 %v2586_v51  ;;  %v2343_v9 = vld [vmem:[#allocation6 + $0x70] sm:$0xf0]  ;;  %v1897_v10 = vld [vmem:[#allocation6 + $0x1a0] sm:$0xf] }
  0x40   :  { %676 = vmatpush.bf16.msrb.mxu3 %v1894_v48  ;;  %v2393_v48 = vld [vmem:[#allocation6 + $0x200] sm:$0xf0]  ;;  %v2049_v13 = vld [vmem:[#allocation6 + $0x50] sm:$0xf]  ;;  %v1717_v20 = vld [vmem:[#allocation6 + $0x38] sm:$0xf] }
  0x41   :  { %635 = vmatpush.bf16.msrb.mxu0 %v1710_v54  ;;  %v1778_v54 = vor.u32 %v2353_v44, %v1777_v41  ;;  %v1938_v55 = vor.u32 %v2393_v48, %v1937_v45  ;;  %v2423_v14 = vld [vmem:[#allocation6 + $0x60] sm:$0xf0]  ;;  %v2338_v21 = vld [vmem:[#allocation6 + $0x48] sm:$0xf0]  ;;  %v2029_v25 = vld [vmem:[#allocation6 + $0x28] sm:$0xf] }
  0x42   :  { %649 = vmatpush.bf16.msrb.mxu1 %v1870_v58  ;;  %v1757_v58 = vld [vmem:[#allocation6 + $0x88] sm:$0xf]  ;;  %v2050_v19 = vor.u32 %v2423_v14, %v2049_v13  ;;  %v2378_v24 = vld [vmem:[#allocation6 + $0x188] sm:$0xf0]  ;;  %v2418_v26 = vld [vmem:[#allocation6 + $0x38] sm:$0xf0] }
  0x43   :  { %663 = vmatpush.bf16.msrb.mxu2 %v1714_v59  ;;  %v2348_v59 = vld [vmem:[#allocation6 + $0x98] sm:$0xf0]  ;;  %v2189_v27 = vld [vmem:[#allocation6 + $0x168] sm:$0xf]  ;;  %v2333_v31 = vld [vmem:[#allocation6 + $0x20] sm:$0xf0] }
  0x44   :  { %677 = vmatpush.bf16.msrb.mxu3 %v1874_v0  ;;  %v2069_v0 = vld [vmem:[#allocation6 + $0x78] sm:$0xf]  ;;  %v1758_v4 = vor.u32 %v2348_v59, %v1757_v58  ;;  %v1857_v32 = vld [vmem:[#allocation6 + $0x150] sm:$0xf]  ;;  %v2373_v35 = vld [vmem:[#allocation6 + $0x160] sm:$0xf0] }
  0x45   :  { %636 = vmatpush.bf16.msrb.mxu0 %v1690_v7  ;;  %v2070_v7 = vor.u32 %v2428_v1, %v2069_v0  ;;  %1585 = vperm.xlu2 %2499, %v1580_v5   ;;  %v2009_v36 = vld [vmem:[#allocation6] sm:$0xf]  ;;  %v2413_v37 = vld [vmem:[#allocation6 + $0x10] sm:$0xf0]  ;;  %v2446_v41 = vld [vmem:[#allocation6 + $0x11c] sm:$0xf]  ;;  %v1858_v49 = vor.u32 %v2373_v35, %v1857_v32 }
  0x46   :  { %650 = vmatpush.bf16.msrb.mxu1 %v1850_v11  ;;  %v2230_v11 = vor.u32 %v2468_v3, %v2229_v2  ;;  %v2169_v39 = vld [vmem:[#allocation6 + $0x140] sm:$0xf]  ;;  %v2311_v44 = vld [vmem:[#allocation6 + $0x26c] sm:$0xf0]  ;;  %v2010_v50 = vor.u32 %v2413_v37, %v2009_v36  ;;  %v2489_v51 = vld [vmem:[#allocation6 + $0x270] sm:$0xf0] }
  0x47   :  { %664 = vmatpush.bf16.msrb.mxu2 %v1694_v12  ;;  %v2383_v12 = vld [vmem:[#allocation6 + $0x1b0] sm:$0xf0]  ;;  %v2157_v46 = vld [vmem:[#allocation6 + $0x120] sm:$0xf]  ;;  %v2001_v52 = vld [vmem:[%s2831_s1] sm:$0xf] }
  0x48   :  { %678 = vmatpush.bf16.msrb.mxu3 %v1854_v15  ;;  %637 = vmatmul.bf16.vlgmr.msrb.gmra.mxu0 %v2635_v56  ;;  %v2209_v15 = vld [vmem:[#allocation6 + $0x190] sm:$0xf]  ;;  %v2317_v48 = vld [vmem:[#allocation6 + $0x260] sm:$0xf]  ;;  %v2410_v53 = vld [vmem:[%s2831_s1 + $0x4] sm:$0xf0] }
  0x49   :  { %685 = vmatpush.bf16.msra.mxu0 %v1838_v16  ;;  %651 = vmatmul.bf16.vlgmr.msrb.gmra.mxu1 %v2640_v63  ;;  %v2463_v16 = vld [vmem:[#allocation6 + $0x1a0] sm:$0xf0]  ;;  %v2003_v58 = vld [vmem:[%s2831_s1 + $0x8] sm:$0xf0]  ;;  %v2131_v62 = vld [vmem:[#allocation6 + $0x104] sm:$0xf0]  ;;  %v2318_v1 = vor.u32 %v2489_v51, %v2317_v48  ;;  %v2668_v5 = vor.u32 %v2410_v53, %v2001_v52 }
  0x4a   :  { %699 = vmatpush.bf16.msra.mxu1 %v1998_v17  ;;  %665 = vmatmul.bf16.vlgmr.msrb.gmra.mxu2 %v2635_v56  ;;  %v1738_v17 = vor.u32 %v2343_v9, %v1737_v8  ;;  %v2210_v23 = vor.u32 %v2463_v16, %v2209_v15  ;;  %v2481_v0 = vld [vmem:[#allocation6 + $0x234] sm:$0xf]  ;;  %v2291_v2 = vld [vmem:[#allocation6 + $0x244] sm:$0xf0]  ;;  %v2137_v3 = vld [vmem:[#allocation6 + $0xf8] sm:$0xf] }
  0x4b   :  { %1254 = vmatpush.bf16.msra.mxu2 %v2150_v18  ;;  %679 = vmatmul.bf16.vlgmr.msrb.gmra.mxu3 %v2640_v63  ;;  %v1898_v18 = vor.u32 %v2383_v12, %v1897_v10  ;;  %v2294_v10 = vor.u32 %v2481_v0, %v2291_v2  ;;  %v2436_v12 = vld [vmem:[#allocation6 + $0xcc] sm:$0xf]  ;;  %v2111_v13 = vld [vmem:[#allocation6 + $0xdc] sm:$0xf0]  ;;  %v2474_v32 = vld [vmem:[#allocation6 + $0x1f8] sm:$0xf0] }
  0x4c   :  { %1268 = vmatpush.bf16.msra.mxu3 %v2310_v22  ;;  %v1877_v22 = vld [vmem:[#allocation6 + $0x178] sm:$0xf]  ;;  %v2476_v14 = vld [vmem:[#allocation6 + $0x20c] sm:$0xf]  ;;  %v2271_v16 = vld [vmem:[#allocation6 + $0x21c] sm:$0xf0] }
  0x4d   :  { %686 = vmatpush.bf16.msra.mxu0 %v1818_v28  ;;  %v2458_v28 = vld [vmem:[#allocation6 + $0x178] sm:$0xf0]  ;;  %v1878_v33 = vor.u32 %v2378_v24, %v1877_v22  ;;  %v2274_v22 = vor.u32 %v2476_v14, %v2271_v16  ;;  %v2431_v24 = vld [vmem:[#allocation6 + $0xa4] sm:$0xf]  ;;  %v2071_v35 = vld [vmem:[#allocation6 + $0x8c] sm:$0xf0] }
  0x4e   :  { %700 = vmatpush.bf16.msra.mxu1 %v1978_v29  ;;  %v1718_v29 = vor.u32 %v2338_v21, %v1717_v20  ;;  %v2190_v38 = vor.u32 %v2458_v28, %v2189_v27  ;;  %v2479_v20 = vld [vmem:[#allocation6 + $0x220] sm:$0xf0]  ;;  %v2114_v21 = vor.u32 %v2436_v12, %v2111_v13  ;;  %v2251_v28 = vld [vmem:[#allocation6 + $0x1f4] sm:$0xf0]  ;;  %v2466_v36 = vld [vmem:[#allocation6 + $0x1bc] sm:$0xf] }
  0x4f   :  { %1255 = vmatpush.bf16.msra.mxu2 %v2130_v30  ;;  %v1697_v30 = vld [vmem:[#allocation6 + $0x10] sm:$0xf]  ;;  %v2461_v48 = vld [vmem:[#allocation6 + $0x194] sm:$0xf]  ;;  %v2057_v51 = vld [vmem:[#allocation6 + $0x58] sm:$0xf] }
  0x50   :  { %1269 = vmatpush.bf16.msra.mxu3 %v2290_v34  ;;  %v2030_v34 = vor.u32 %v2418_v26, %v2029_v25  ;;  %v1698_v45 = vor.u32 %v2333_v31, %v1697_v30  ;;  %v2091_v25 = vld [vmem:[#allocation6 + $0xb4] sm:$0xf0]  ;;  %v2471_v26 = vld [vmem:[#allocation6 + $0x1e4] sm:$0xf]  ;;  %v2434_v30 = vld [vmem:[#allocation6 + $0xb8] sm:$0xf0] }
  0x51   :  { %687 = vmatpush.bf16.msra.mxu0 %v1798_v40  ;;  %v2453_v40 = vld [vmem:[#allocation6 + $0x150] sm:$0xf0]  ;;  %v2257_v31 = vld [vmem:[#allocation6 + $0x1e8] sm:$0xf]  ;;  %v2424_v52 = vld [vmem:[#allocation6 + $0x68] sm:$0xf0] }
  0x52   :  { %701 = vmatpush.bf16.msra.mxu1 %v1958_v42  ;;  %v2151_v42 = vld [vmem:[#allocation6 + $0x12c] sm:$0xf0]  ;;  %v2258_v37 = vor.u32 %v2474_v32, %v2257_v31  ;;  %v2217_v53 = vld [vmem:[#allocation6 + $0x198] sm:$0xf]  ;;  %v2191_v0 = vld [vmem:[#allocation6 + $0x17c] sm:$0xf0] }
  0x53   :  { %1256 = vmatpush.bf16.msra.mxu2 %v2110_v43  ;;  %v2486_v43 = vld [vmem:[#allocation6 + $0x25c] sm:$0xf]  ;;  %v2419_v2 = vld [vmem:[#allocation6 + $0x40] sm:$0xf0]  ;;  %v2171_v13 = vld [vmem:[#allocation6 + $0x154] sm:$0xf0] }
  0x54   :  { %1270 = vmatpush.bf16.msra.mxu3 %v2270_v47  ;;  %v2449_v47 = vld [vmem:[#allocation6 + $0x130] sm:$0xf0]  ;;  %v2314_v59 = vor.u32 %v2486_v43, %v2311_v44  ;;  %v2451_v12 = vld [vmem:[#allocation6 + $0x144] sm:$0xf]  ;;  %v2017_v14 = vld [vmem:[#allocation6 + $0x8] sm:$0xf] }
  0x55   :  { %688 = vmatpush.bf16.msra.mxu0 %v1778_v54  ;;  %v2170_v54 = vor.u32 %v2453_v40, %v2169_v39  ;;  %v2158_v60 = vor.u32 %v2449_v47, %v2157_v46  ;;  %v2077_v39 = vld [vmem:[#allocation6 + $0x80] sm:$0xf]  ;;  %v2429_v40 = vld [vmem:[#allocation6 + $0x90] sm:$0xf0]  ;;  %v2051_v47 = vld [vmem:[#allocation6 + $0x64] sm:$0xf0] }
  0x56   :  { %702 = vmatpush.bf16.msra.mxu1 %v1938_v55  ;;  %v2154_v55 = vor.u32 %v2446_v41, %v2151_v42  ;;  %v2237_v41 = vld [vmem:[#allocation6 + $0x1c0] sm:$0xf]  ;;  %v2469_v42 = vld [vmem:[#allocation6 + $0x1d0] sm:$0xf0]  ;;  %v2414_v16 = vld [vmem:[#allocation6 + $0x18] sm:$0xf0] }
  0x57   :  { %1257 = vmatpush.bf16.msra.mxu2 %v2090_v57  ;;  %v2409_v57 = vld [vmem:[%s2831_s1 + $0x4] sm:$0xf]  ;;  %s1654_s19 = sshll.u32 %s2834_s4, 4  ;;  %s2589_s20 = smov [#allocation9]   ;;  %s1655_s19 = int_to_ptr.hbm [resolvable:$true] %s1654_s19 }
  0x58   :  { %1271 = vmatpush.bf16.msra.mxu3 %v2250_v61  ;;  %v2441_v61 = vld [vmem:[#allocation6 + $0xf4] sm:$0xf]  ;;  %v2670_v8 = vor.u32 %v2409_v57, %v2003_v58  ;;  %v2058_v58 = vor.u32 %v2424_v52, %v2057_v51  ;;  %v2285_v51 = vld [vmem:[#allocation6 + $0x218] sm:$0xf]  ;;  %v2480_v52 = vld [vmem:[#allocation6 + $0x228] sm:$0xf0] }
  0x59   :  { %689 = vmatpush.bf16.msra.mxu0 %v1758_v4  ;;  %v2444_v4 = vld [vmem:[#allocation6 + $0x108] sm:$0xf0]  ;;  %v2134_v9 = vor.u32 %v2441_v61, %v2131_v62  ;;  %v2421_v46 = vld [vmem:[#allocation6 + $0x54] sm:$0xf]  ;;  %s1652_s21 = sshll.u32 %s2589_s20, 4  ;;  %s1653_s21 = int_to_ptr.vmem [resolvable:$true] %s1652_s21 }
  0x5a   :  { %703 = vmatpush.bf16.msra.mxu1 %v1918_v6  ;;  %v2297_v6 = vld [vmem:[#allocation6 + $0x238] sm:$0xf]  ;;  %v2456_v61 = vld [vmem:[#allocation6 + $0x16c] sm:$0xf] }
  0x5b   :  { %1258 = vmatpush.bf16.msra.mxu2 %v2070_v7  ;;  %v2484_v7 = vld [vmem:[#allocation6 + $0x248] sm:$0xf0] }
  0x5c   :  { %1272 = vmatpush.bf16.msra.mxu3 %v2230_v11  ;;  %v2138_v11 = vor.u32 %v2444_v4, %v2137_v3  ;;  %v2298_v15 = vor.u32 %v2484_v7, %v2297_v6  ;;  %v2197_v3 = vld [vmem:[#allocation6 + $0x170] sm:$0xf]  ;;  %v2459_v4 = vld [vmem:[#allocation6 + $0x180] sm:$0xf0] }
  0x5d   :  { %690 = vmatpush.bf16.msra.mxu0 %v1738_v17  ;;  %v2117_v17 = vld [vmem:[#allocation6 + $0xd0] sm:$0xf]  ;;  %v2411_v7 = vld [vmem:[#allocation6 + $0x4] sm:$0xf] }
  0x5e   :  { %704 = vmatpush.bf16.msra.mxu1 %v1898_v18  ;;  %v2439_v18 = vld [vmem:[#allocation6 + $0xe0] sm:$0xf0] }
  0x5f   :  { %1259 = vmatpush.bf16.msra.mxu2 %v2050_v19  ;;  %v2277_v19 = vld [vmem:[#allocation6 + $0x210] sm:$0xf] }
  0x60   :  { %1273 = vmatpush.bf16.msra.mxu3 %v2210_v23  ;;  %v2118_v23 = vor.u32 %v2439_v18, %v2117_v17  ;;  %v2278_v27 = vor.u32 %v2479_v20, %v2277_v19  ;;  %v2177_v17 = vld [vmem:[#allocation6 + $0x148] sm:$0xf]  ;;  %v2454_v18 = vld [vmem:[#allocation6 + $0x158] sm:$0xf0]  ;;  %v2447_v19 = vld [vmem:[#allocation6 + $0x124] sm:$0xf] }
  0x61   :  { %691 = vmatpush.bf16.msra.mxu0 %v1718_v29  ;;  %v2097_v29 = vld [vmem:[#allocation6 + $0xa8] sm:$0xf]  ;;  %v2159_v20 = vld [vmem:[#allocation6 + $0x134] sm:$0xf0] }
  0x62   :  { %705 = vmatpush.bf16.msra.mxu1 %v1878_v33  ;;  %v2254_v33 = vor.u32 %v2471_v26, %v2251_v28  ;;  %v2174_v26 = vor.u32 %v2451_v12, %v2171_v13  ;;  %v2325_v28 = vld [vmem:[#allocation6 + $0x268] sm:$0xf]  ;;  %v2162_v31 = vor.u32 %v2447_v19, %v2159_v20  ;;  %v2239_v12 = vld [vmem:[#allocation6 + $0x1d4] sm:$0xf0]  ;;  %v2422_v20 = vld [vmem:[#allocation6 + $0x5c] sm:$0xf] }
  0x63   :  { %1260 = vmatpush.bf16.msra.mxu2 %v2030_v34  ;;  %v2426_v34 = vld [vmem:[#allocation6 + $0x7c] sm:$0xf]  ;;  %v2085_v13 = vld [vmem:[#allocation6 + $0x88] sm:$0xf] }
  0x64   :  { %1274 = vmatpush.bf16.msra.mxu3 %v2190_v38  ;;  %v2231_v38 = vld [vmem:[#allocation6 + $0x1cc] sm:$0xf0]  ;;  %v2074_v43 = vor.u32 %v2426_v34, %v2071_v35  ;;  %v2482_v34 = vld [vmem:[#allocation6 + $0x23c] sm:$0xf] }
  0x65   :  { %692 = vmatpush.bf16.msra.mxu0 %v1698_v45  ;;  %v2234_v44 = vor.u32 %v2466_v36, %v2231_v38  ;;  %v2078_v45 = vor.u32 %v2429_v40, %v2077_v39  ;;  %v2299_v36 = vld [vmem:[#allocation6 + $0x24c] sm:$0xf0]  ;;  %v2445_v38 = vld [vmem:[#allocation6 + $0x110] sm:$0xf0]  ;;  %v2305_v39 = vld [vmem:[#allocation6 + $0x240] sm:$0xf] }
  0x66   :  { %706 = vmatpush.bf16.msra.mxu1 %v1858_v49  ;;  %v2238_v49 = vor.u32 %v2469_v42, %v2237_v41  ;;  %v2485_v40 = vld [vmem:[#allocation6 + $0x250] sm:$0xf0]  ;;  %v2302_v42 = vor.u32 %v2482_v34, %v2299_v36  ;;  %v2199_v34 = vld [vmem:[#allocation6 + $0x184] sm:$0xf0]  ;;  %v2420_v36 = vld [vmem:[#allocation6 + $0x48] sm:$0xf0] }
  0x67   :  { %1261 = vmatpush.bf16.msra.mxu2 %v2010_v50  ;;  %v2211_v50 = vld [vmem:[#allocation6 + $0x1a4] sm:$0xf0] }
  0x68   :  { %1275 = vmatpush.bf16.msra.mxu3 %v2170_v54  ;;  %693 = vmatmul.bf16.vlgmr.msra.gmra.mxu0 %v2635_v56  ;;  %v2094_v56 = vor.u32 %v2431_v24, %v2091_v25  ;;  %v2464_v54 = vld [vmem:[#allocation6 + $0x1a8] sm:$0xf0]  ;;  %v2214_v57 = vor.u32 %v2461_v48, %v2211_v50  ;;  %v2165_v24 = vld [vmem:[#allocation6 + $0x128] sm:$0xf]  ;;  %v2450_v25 = vld [vmem:[#allocation6 + $0x138] sm:$0xf0] }
  0x69   :  { %1282 = vmatpush.bf16.msrb.mxu0 %v2154_v55  ;;  %707 = vmatmul.bf16.vlgmr.msra.gmra.mxu1 %v2640_v63  ;;  %v2098_v63 = vor.u32 %v2434_v30, %v2097_v29  ;;  %v2054_v55 = vor.u32 %v2421_v46, %v2051_v47  ;;  %v2218_v62 = vor.u32 %v2464_v54, %v2217_v53  ;;  %v2490_v29 = vld [vmem:[#allocation6 + $0x278] sm:$0xf0]  ;;  %v2477_v46 = vld [vmem:[#allocation6 + $0x214] sm:$0xf]  ;;  %v2279_v48 = vld [vmem:[#allocation6 + $0x224] sm:$0xf0] }
  0x6a   :  { %1296 = vmatpush.bf16.msrb.mxu1 %v2314_v59  ;;  %1262 = vmatmul.bf16.vlgmr.msra.gmra.mxu2 %v2668_v5  ;;  %v2416_v59 = vld [vmem:[#allocation6 + $0x2c] sm:$0xf]  ;;  %v2178_v30 = vor.u32 %v2454_v18, %v2177_v17  ;;  %v2326_v35 = vor.u32 %v2490_v29, %v2325_v28  ;;  %v2306_v47 = vor.u32 %v2485_v40, %v2305_v39  ;;  %v2465_v28 = vld [vmem:[#allocation6 + $0x1b0] sm:$0xf0] }
  0x6b   :  { %1310 = vmatpush.bf16.msrb.mxu2 %v2158_v60  ;;  %1276 = vmatmul.bf16.vlgmr.msra.gmra.mxu3 %v2670_v8  ;;  %v2031_v60 = vld [vmem:[#allocation6 + $0x3c] sm:$0xf0]  ;;  %v2440_v50 = vld [vmem:[#allocation6 + $0xe8] sm:$0xf0]  ;;  %v2282_v54 = vor.u32 %v2477_v46, %v2279_v48  ;;  %v2415_v48 = vld [vmem:[#allocation6 + $0x20] sm:$0xf0] }
  0x6c   :  { %1324 = vmatpush.bf16.msrb.mxu3 %v2318_v1  ;;  %v2037_v1 = vld [vmem:[#allocation6 + $0x30] sm:$0xf]  ;;  %v2034_v6 = vor.u32 %v2416_v59, %v2031_v60  ;;  %v2472_v59 = vld [vmem:[#allocation6 + $0x1ec] sm:$0xf]  ;;  %v2286_v60 = vor.u32 %v2480_v52, %v2285_v51  ;;  %v2179_v46 = vld [vmem:[#allocation6 + $0x15c] sm:$0xf0] }
  0x6d   :  { %1283 = vmatpush.bf16.msrb.mxu0 %v2134_v9  ;;  %v2011_v9 = vld [vmem:[#allocation6 + $0x14] sm:$0xf0] }
  0x6e   :  { %1297 = vmatpush.bf16.msrb.mxu1 %v2294_v10  ;;  %v2194_v10 = vor.u32 %v2456_v61, %v2191_v0  ;;  %v2259_v61 = vld [vmem:[#allocation6 + $0x1fc] sm:$0xf0]  ;;  %v2435_v0 = vld [vmem:[#allocation6 + $0xc0] sm:$0xf0] }
  0x6f   :  { %1311 = vmatpush.bf16.msrb.mxu2 %v2138_v11  ;;  %v2038_v11 = vor.u32 %v2419_v2, %v2037_v1  ;;  %v2265_v1 = vld [vmem:[#allocation6 + $0x1f0] sm:$0xf]  ;;  %v2475_v2 = vld [vmem:[#allocation6 + $0x200] sm:$0xf0] }
  0x70   :  { %1325 = vmatpush.bf16.msrb.mxu3 %v2298_v15  ;;  %v2198_v15 = vor.u32 %v2459_v4, %v2197_v3  ;;  %v2262_v4 = vor.u32 %v2472_v59, %v2259_v61 }
  0x71   :  { %1284 = vmatpush.bf16.msrb.mxu0 %v2114_v21  ;;  %v2487_v21 = vld [vmem:[#allocation6 + $0x264] sm:$0xf] }
  0x72   :  { %1298 = vmatpush.bf16.msrb.mxu1 %v2274_v22  ;;  %v2014_v22 = vor.u32 %v2411_v7, %v2011_v9  ;;  %v2427_v7 = vld [vmem:[#allocation6 + $0x84] sm:$0xf]  ;;  %v2079_v9 = vld [vmem:[#allocation6 + $0x94] sm:$0xf0] }
  0x73   :  { %1312 = vmatpush.bf16.msrb.mxu2 %v2118_v23  ;;  %v2319_v23 = vld [vmem:[#allocation6 + $0x274] sm:$0xf0]  ;;  %v2082_v17 = vor.u32 %v2427_v7, %v2079_v9  ;;  %v37_v7 = vlaneseq }
  0x74   :  { %1326 = vmatpush.bf16.msrb.mxu3 %v2278_v27  ;;  %v2018_v27 = vor.u32 %v2414_v16, %v2017_v14  ;;  %v2322_v32 = vor.u32 %v2487_v21, %v2319_v23  ;;  %v2430_v14 = vld [vmem:[#allocation6 + $0x98] sm:$0xf0]  ;;  %v2059_v21 = vld [vmem:[#allocation6 + $0x6c] sm:$0xf0] }
  0x75   :  { %1285 = vmatpush.bf16.msrb.mxu0 %v2094_v56  ;;  %v2166_v56 = vor.u32 %v2450_v25, %v2165_v24  ;;  %v2470_v16 = vld [vmem:[#allocation6 + $0x1d8] sm:$0xf0]  ;;  %v2086_v19 = vor.u32 %v2430_v14, %v2085_v13  ;;  %v2219_v24 = vld [vmem:[#allocation6 + $0x1ac] sm:$0xf0]  ;;  %v2065_v25 = vld [vmem:[#allocation6 + $0x60] sm:$0xf]  ;;  %v2062_v29 = vor.u32 %v2422_v20, %v2059_v21 }
  0x76   :  { %1299 = vmatpush.bf16.msrb.mxu1 %v2254_v33  ;;  %v2442_v33 = vld [vmem:[#allocation6 + $0xfc] sm:$0xf]  ;;  %v38_v9 = vand.u32 127, %v37_v7 }
  0x77   :  { %1313 = vmatpush.bf16.msrb.mxu2 %v2098_v63  ;;  %v2139_v63 = vld [vmem:[#allocation6 + $0x10c] sm:$0xf0] }
  0x78   :  { %1327 = vmatpush.bf16.msrb.mxu3 %v2258_v37  ;;  %v2145_v37 = vld [vmem:[#allocation6 + $0x100] sm:$0xf]  ;;  %v2142_v41 = vor.u32 %v2442_v33, %v2139_v63  ;;  %v2457_v33 = vld [vmem:[#allocation6 + $0x174] sm:$0xf] }
  0x79   :  { %1286 = vmatpush.bf16.msrb.mxu0 %v2074_v43  ;;  %v2146_v43 = vor.u32 %v2445_v38, %v2145_v37  ;;  %v2205_v37 = vld [vmem:[#allocation6 + $0x178] sm:$0xf]  ;;  %v2460_v38 = vld [vmem:[#allocation6 + $0x188] sm:$0xf0]  ;;  %v2202_v40 = vor.u32 %v2457_v33, %v2199_v34 }
  0x7a   :  { %1300 = vmatpush.bf16.msrb.mxu1 %v2234_v44  ;;  %v2437_v44 = vld [vmem:[#allocation6 + $0xd4] sm:$0xf] }
  0x7b   :  { %1314 = vmatpush.bf16.msrb.mxu2 %v2078_v45  ;;  %v2119_v45 = vld [vmem:[#allocation6 + $0xe4] sm:$0xf0] }
  0x7c   :  { %1328 = vmatpush.bf16.msrb.mxu3 %v2238_v49  ;;  %v2125_v49 = vld [vmem:[#allocation6 + $0xd8] sm:$0xf]  ;;  %v2122_v53 = vor.u32 %v2437_v44, %v2119_v45  ;;  %v2452_v44 = vld [vmem:[#allocation6 + $0x14c] sm:$0xf]  ;;  %v2206_v45 = vor.u32 %v2460_v38, %v2205_v37 }
  0x7d   :  { %1287 = vmatpush.bf16.msrb.mxu0 %v2054_v55  ;;  %v2126_v55 = vor.u32 %v2440_v50, %v2125_v49  ;;  %v2185_v49 = vld [vmem:[#allocation6 + $0x150] sm:$0xf]  ;;  %v2455_v50 = vld [vmem:[#allocation6 + $0x160] sm:$0xf0]  ;;  %v2182_v52 = vor.u32 %v2452_v44, %v2179_v46  ;;  %v41_v44 = vadd.s32 384, %v38_v9 }
  0x7e   :  { %1301 = vmatpush.bf16.msrb.mxu1 %v2214_v57  ;;  %v2432_v57 = vld [vmem:[#allocation6 + $0xac] sm:$0xf] }
  0x7f   :  { %1315 = vmatpush.bf16.msrb.mxu2 %v2058_v58  ;;  %v2099_v58 = vld [vmem:[#allocation6 + $0xbc] sm:$0xf0]  ;;  %vm1397_vm6 = vcmp.ge.s32.totalorder %v41_v44, 448 }
  0x80   :  { %1329 = vmatpush.bf16.msrb.mxu3 %v2218_v62  ;;  %v2105_v62 = vld [vmem:[#allocation6 + $0xb0] sm:$0xf]  ;;  %v2102_v3 = vor.u32 %v2432_v57, %v2099_v58 }
  0x81   :  { %1288 = vmatpush.bf16.msrb.mxu0 %v2034_v6  ;;  %v2106_v6 = vor.u32 %v2435_v0, %v2105_v62 }
  0x82   :  { %1302 = vmatpush.bf16.msrb.mxu1 %v2194_v10  ;;  %v2467_v10 = vld [vmem:[#allocation6 + $0x1c4] sm:$0xf] }
  0x83   :  { %1316 = vmatpush.bf16.msrb.mxu2 %v2038_v11  ;;  %v2266_v11 = vor.u32 %v2475_v2, %v2265_v1  ;;  %v2242_v18 = vor.u32 %v2467_v10, %v2239_v12 }
  0x84   :  { %1330 = vmatpush.bf16.msrb.mxu3 %v2198_v15  ;;  %v2245_v15 = vld [vmem:[#allocation6 + $0x1c8] sm:$0xf] }
  0x85   :  { %1289 = vmatpush.bf16.msrb.mxu0 %v2014_v22  ;;  %v2462_v22 = vld [vmem:[#allocation6 + $0x19c] sm:$0xf]  ;;  %v2246_v23 = vor.u32 %v2470_v16, %v2245_v15  ;;  %v40_v15 = vadd.s32 256, %v38_v9 }
  0x86   :  { %1303 = vmatpush.bf16.msrb.mxu1 %v2174_v26  ;;  %v2425_v26 = vld [vmem:[#allocation6 + $0x70] sm:$0xf0] }
  0x87   :  { %1317 = vmatpush.bf16.msrb.mxu2 %v2018_v27  ;;  %v2225_v27 = vld [vmem:[#allocation6 + $0x1a0] sm:$0xf] }
  0x88   :  { %1331 = vmatpush.bf16.msrb.mxu3 %v2178_v30  ;;  %1290 = vmatmul.bf16.vlgmr.msrb.gmra.mxu0 %v2668_v5  ;;  %v2222_v30 = vor.u32 %v2462_v22, %v2219_v24  ;;  %v2226_v63 = vor.u32 %v2465_v28, %v2225_v27 }
  0x89   :  { %1338 = vmatpush.bf16.msra.mxu0 %v2162_v31  ;;  %1304 = vmatmul.bf16.vlgmr.msrb.gmra.mxu1 %v2670_v8  ;;  %v2066_v31 = vor.u32 %v2425_v26, %v2065_v25 }
  0x8a   :  { %1352 = vmatpush.bf16.msra.mxu1 %v2322_v32  ;;  %1318 = vmatmul.bf16.vlgmr.msrb.gmra.mxu2 %v2668_v5  ;;  %v2417_v32 = vld [vmem:[#allocation6 + $0x34] sm:$0xf] }
  0x8b   :  { %1366 = vmatpush.bf16.msra.mxu2 %v2166_v56  ;;  %1332 = vmatmul.bf16.vlgmr.msrb.gmra.mxu3 %v2670_v8  ;;  %v2039_v56 = vld [vmem:[#allocation6 + $0x44] sm:$0xf0] }
  0x8c   :  { %1380 = vmatpush.bf16.msra.mxu3 %v2326_v35  ;;  %v2045_v35 = vld [vmem:[#allocation6 + $0x38] sm:$0xf]  ;;  %v2042_v39 = vor.u32 %v2417_v32, %v2039_v56 }
  0x8d   :  { %1339 = vmatpush.bf16.msra.mxu0 %v2142_v41  ;;  %v2046_v41 = vor.u32 %v2420_v36, %v2045_v35 }
  0x8e   :  { %1353 = vmatpush.bf16.msra.mxu1 %v2302_v42  ;;  %v2412_v42 = vld [vmem:[#allocation6 + $0xc] sm:$0xf] }
  0x8f   :  { %1367 = vmatpush.bf16.msra.mxu2 %v2146_v43  ;;  %v2019_v43 = vld [vmem:[#allocation6 + $0x1c] sm:$0xf0] }
  0x90   :  { %1381 = vmatpush.bf16.msra.mxu3 %v2306_v47  ;;  %v2025_v47 = vld [vmem:[#allocation6 + $0x10] sm:$0xf]  ;;  %v2022_v51 = vor.u32 %v2412_v42, %v2019_v43  ;;  %v2587_v43 = vmov 0.0  }
  0x91   :  { %1340 = vmatpush.bf16.msra.mxu0 %v2122_v53  ;;  %v2026_v53 = vor.u32 %v2415_v48, %v2025_v47  ;;  %1490 = vst.msk [vmem:[#allocation5] sm:$0xff] %vm1485_vm3, %v2587_v43 }
  0x92   :  { %1354 = vmatpush.bf16.msra.mxu1 %v2282_v54  ;;  %v2186_v54 = vor.u32 %v2455_v50, %v2185_v49  ;;  %1488 = vst.msk [vmem:[#allocation4] sm:$0xff] %vm1485_vm3, %v2587_v43 }
  0x93   :  { %1368 = vmatpush.bf16.msra.mxu2 %v2126_v55  ;;  %1489 = vst.msk [vmem:[#allocation4 + $0x8] sm:$0xff] %vm1485_vm3, %v2587_v43 }
  0x94   :  { %1382 = vmatpush.bf16.msra.mxu3 %v2286_v60  ;;  %1491 = vst.msk [vmem:[#allocation5 + $0x8] sm:$0xff] %vm1485_vm3, %v2587_v43 }
  0x95   :  { %1341 = vmatpush.bf16.msra.mxu0 %v2102_v3 }
  0x96   :  { %1355 = vmatpush.bf16.msra.mxu1 %v2262_v4 }
  0x97   :  { %1369 = vmatpush.bf16.msra.mxu2 %v2106_v6  ;;  %v2696_v6 = vpop.permute.xlu2 %1582 }
  0x98   :  { %1383 = vmatpush.bf16.msra.mxu3 %v2266_v11  ;;  %v39_v11 = vadd.s32 128, %v38_v9  ;;  %vm1587_vm4 = vcmp.eq.s32.totalorder %v38_v9, %v2696_v6  ;;  %vm1589_vm7 = vcmp.eq.s32.totalorder %v40_v15, %v2696_v6  ;;  %vm1590_vm8 = vcmp.eq.s32.totalorder %v41_v44, %v2696_v6 }
  0x99   :  { %1342 = vmatpush.bf16.msra.mxu0 %v2082_v17 }
  0x9a   :  { %1356 = vmatpush.bf16.msra.mxu1 %v2242_v18  ;;  %vm1588_vm5 = vcmp.eq.s32.totalorder %v39_v11, %v2696_v6 }
  0x9b   :  { %1370 = vmatpush.bf16.msra.mxu2 %v2086_v19 }
  0x9c   :  { %1384 = vmatpush.bf16.msra.mxu3 %v2246_v23 }
  0x9d   :  { %1343 = vmatpush.bf16.msra.mxu0 %v2062_v29 }
  0x9e   :  { %1357 = vmatpush.bf16.msra.mxu1 %v2222_v30 }
  0x9f   :  { %1371 = vmatpush.bf16.msra.mxu2 %v2066_v31  ;;  %v2698_v13 = vpop.permute.xlu2 %1585 }
  0xa0   :  { %1385 = vmatpush.bf16.msra.mxu3 %v2226_v63  ;;  %vm1592_vm0 = vcmp.eq.s32.totalorder %v38_v9, %v2698_v13  ;;  %vm1593_vm1 = vcmp.eq.s32.totalorder %v39_v11, %v2698_v13  ;;  %vm1594_vm2 = vcmp.eq.s32.totalorder %v40_v15, %v2698_v13  ;;  %vm1595_vm10 = vcmp.eq.s32.totalorder %v41_v44, %v2698_v13 }
  0xa1   :  { %1344 = vmatpush.bf16.msra.mxu0 %v2042_v39 }
  0xa2   :  { %1358 = vmatpush.bf16.msra.mxu1 %v2202_v40 }
  0xa3   :  { %1372 = vmatpush.bf16.msra.mxu2 %v2046_v41 }
  0xa4   :  { %1386 = vmatpush.bf16.msra.mxu3 %v2206_v45 }
  0xa5   :  { %1345 = vmatpush.bf16.msra.mxu0 %v2022_v51  ;;  %v582_v55 = vpop.f32.mrf.mxu0 }
  0xa6   :  { %1359 = vmatpush.bf16.msra.mxu1 %v2182_v52  ;;  %v596_v57 = vpop.f32.mrf.mxu1 }
  0xa7   :  { %1373 = vmatpush.bf16.msra.mxu2 %v2026_v53  ;;  %v2684_v58 = vadd.f32 %v596_v57, %v582_v55  ;;  %v42_v53 = vadd.s32 512, %v38_v9 }
  0xa8   :  { %1387 = vmatpush.bf16.msra.mxu3 %v2186_v54  ;;  %1346 = vmatmul.bf16.vlgmr.msra.gmra.mxu0 %v2668_v5 }
  0xa9   :  { %1360 = vmatmul.bf16.vlgmr.msra.gmra.mxu1 %v2670_v8  ;;  %v1597_v48 = vsel %vm1587_vm4, %v2684_v58, 0.0  ;;  %vm1591_vm9 = vcmp.eq.s32.totalorder %v42_v53, %v2696_v6  ;;  %vm1596_vm11 = vcmp.eq.s32.totalorder %v42_v53, %v2698_v13  ;;  %v2588_v13 = vmov -inf  }
  0xaa   :  { %1374 = vmatmul.bf16.vlgmr.msra.gmra.mxu2 %v2668_v5  ;;  %1486 = vst.msk [vmem:[#allocation3] sm:$0xff] %vm1485_vm3, %v2588_v13 }
  0xab   :  { %1388 = vmatmul.bf16.vlgmr.msra.gmra.mxu3 %v2670_v8  ;;  %1487 = vst.msk [vmem:[#allocation3 + $0x8] sm:$0xff] %vm1485_vm3, %v2588_v13 }
  0xad   :  { %v610_v59 = vpop.f32.mrf.mxu2  ;;  %v584_v0 = vpop.f32.mrf.mxu0 }
  0xae   :  { %v624_v60 = vpop.f32.mrf.mxu3  ;;  %v598_v1 = vpop.f32.mrf.mxu1 }
  0xaf   :  { %v2686_v61 = vadd.f32 %v624_v60, %v610_v59  ;;  %v2690_v2 = vadd.f32 %v598_v1, %v584_v0 }
  0xb1   :  { %v1469_v62 = vpack.c.bf16 %v2686_v61, %v2684_v58  ;;  %v1602_v18 = vsel %vm1592_vm0, %v2690_v2, 0.0  ;;  %v1598_v49 = vsel %vm1588_vm5, %v2686_v61, 0.0 }
  0xb2   :  { %v1607_v54 = vadd.f32 %v1598_v49, %v1597_v48 }
  0xb3   :  { %1475 = vst [vmem:[#allocation9] sm:$0xff] %v1469_v62 }
  0xb5   :  { %v612_v3 = vpop.f32.mrf.mxu2 }
  0xb6   :  { %v626_v5 = vpop.f32.mrf.mxu3 }
  0xb7   :  { %v2692_v4 = vadd.f32 %v626_v5, %v612_v3 }
  0xb9   :  { %v1472_v8 = vpack.c.bf16 %v2692_v4, %v2690_v2  ;;  %v1603_v19 = vsel %vm1593_vm1, %v2692_v4, 0.0 }
  0xba   :  { %v1613_v23 = vadd.f32 %v1603_v19, %v1602_v18 }
  0xbb   :  { %1478 = vst [vmem:[#allocation9 + $0x14] sm:$0xff] %v1472_v8 }
  0xc5   :  { %v638_v10 = vpop.f32.mrf.mxu0 }
  0xc6   :  { %v652_v12 = vpop.f32.mrf.mxu1 }
  0xc7   :  { %v2724_v51 = vadd.f32 %v652_v12, %v638_v10 }
  0xc9   :  { %v1599_v59 = vsel %vm1589_vm7, %v2724_v51, 0.0  ;;  %v1494_v10 = vmax.f32 %v2684_v58, %v2724_v51 }
  0xca   :  { %v1608_v7 = vadd.f32 %v1607_v54, %v1599_v59 }
  0xcd   :  { %v666_v14 = vpop.f32.mrf.mxu2  ;;  %v640_v16 = vpop.f32.mrf.mxu0 }
  0xce   :  { %v680_v17 = vpop.f32.mrf.mxu3  ;;  %v654_v20 = vpop.f32.mrf.mxu1 }
  0xcf   :  { %v681_v21 = vadd.f32 %v680_v17, %v666_v14  ;;  %v2705_v22 = vadd.f32 %v654_v20, %v640_v16 }
  0xd1   :  { %v1604_v24 = vsel %vm1594_vm2, %v2705_v22, 0.0 }
  0xd2   :  { %v2708_v25 = vadd.f32 %v1613_v23, %v1604_v24 }
  0xd5   :  { %v668_v26 = vpop.f32.mrf.mxu2 }
  0xd6   :  { %v682_v27 = vpop.f32.mrf.mxu3 }
  0xd7   :  { %v683_v28 = vadd.f32 %v682_v27, %v668_v26 }
  0xe5   :  { %v694_v31 = vpop.f32.mrf.mxu0 }
  0xe6   :  { %v708_v32 = vpop.f32.mrf.mxu1 }
  0xe7   :  { %v709_v0 = vadd.f32 %v708_v32, %v694_v31 }
  0xed   :  { %v1263_v29 = vpop.f32.mrf.mxu2  ;;  %v2710_v63 = vpop.f32.mrf.mxu0 }
  0xee   :  { %v1277_v30 = vpop.f32.mrf.mxu3  ;;  %v2712_v34 = vpop.f32.mrf.mxu1 }
  0xef   :  { %v711_v27 = vadd.f32 %v2712_v34, %v2710_v63  ;;  %v1500_v30 = vmax.f32 %v2690_v2, %v2705_v22  ;;  %v1577_v34 = vld [vmem:[#allocation5] sm:$0xff] }
  0xf5   :  { %v1265_v56 = vpop.f32.mrf.mxu2 }
  0xf6   :  { %v1279_v33 = vpop.f32.mrf.mxu3 }
 0x105   :  { %v1291_v35 = vpop.f32.mrf.mxu0 }
 0x106   :  { %v1305_v36 = vpop.f32.mrf.mxu1  ;;  %v2769_v35 = vld [vmem:[#allocation3] sm:$0xff] }
 0x10d   :  { %v1319_v37 = vpop.f32.mrf.mxu2  ;;  %v1293_v39 = vpop.f32.mrf.mxu0 }
 0x10e   :  { %v1333_v38 = vpop.f32.mrf.mxu3  ;;  %v1307_v40 = vpop.f32.mrf.mxu1 }
 0x115   :  { %v1321_v41 = vpop.f32.mrf.mxu2 }
 0x116   :  { %v1335_v42 = vpop.f32.mrf.mxu3  ;;  %v2780_v41 = vld [vmem:[#allocation3 + $0x8] sm:$0xff] }
 0x125   :  { %v1347_v45 = vpop.f32.mrf.mxu0 }
 0x126   :  { %v1361_v46 = vpop.f32.mrf.mxu1 }
 0x127   :  { %v1362_v47 = vadd.f32 %v1361_v46, %v1347_v45 }
 0x129   :  { %v1432_v50 = vsel %vm1397_vm6, %v1362_v47, 0.0 }
 0x12a   :  { %v2726_v52 = vadd.f32 %v1432_v50, %v681_v21 }
 0x12c   :  { %v1470_v55 = vpack.c.bf16 %v2726_v52, %v2724_v51  ;;  %v1600_v5 = vsel %vm1590_vm8, %v2726_v52, 0.0  ;;  %v1495_v14 = vmax.f32 %v2686_v61, %v2726_v52 }
 0x12d   :  { %v1375_v57 = vpop.f32.mrf.mxu2  ;;  %v1349_v62 = vpop.f32.mrf.mxu0  ;;  %v1609_v12 = vadd.f32 %v1608_v7, %v1600_v5 }
 0x12e   :  { %v1389_v60 = vpop.f32.mrf.mxu3  ;;  %1476 = vst [vmem:[#allocation9 + $0x8] sm:$0xff] %v1470_v55  ;;  %v1363_v3 = vpop.f32.mrf.mxu1 }
 0x12f   :  { %v1390_v1 = vadd.f32 %v1389_v60, %v1375_v57  ;;  %v1364_v8 = vadd.f32 %v1363_v3, %v1349_v62 }
 0x131   :  { %v2734_v9 = vadd.f32 %v1390_v1, %v709_v0  ;;  %v1437_v11 = vsel %vm1397_vm6, %v1364_v8, 0.0 }
 0x132   :  { %v2744_v16 = vadd.f32 %v1437_v11, %v683_v28 }
 0x133   :  { %v1471_v15 = vpack.c.bf16 %v2734_v9, %v2734_v9  ;;  %v1601_v6 = vsel %vm1591_vm9, %v2734_v9, 0.0  ;;  %v1496_v17 = vmax.f32 %v1494_v10, %v2734_v9 }
 0x134   :  { %v1610_v18 = vadd.f32 %v1609_v12, %v1601_v6  ;;  %v1473_v19 = vpack.c.bf16 %v2744_v16, %v2705_v22  ;;  %v1605_v23 = vsel %vm1595_vm10, %v2744_v16, 0.0  ;;  %v1501_v32 = vmax.f32 %v2692_v4, %v2744_v16 }
 0x135   :  { %1477 = vst [vmem:[#allocation9 + $0x10] sm:$0xf] %v1471_v15  ;;  %v1377_v20 = vpop.f32.mrf.mxu2  ;;  %v1497_v21 = vmax.f32 %v1496_v17, %v1495_v14  ;;  %v1615_v26 = vadd.f32 %v2708_v25, %v1605_v23 }
 0x136   :  { %v1391_v24 = vpop.f32.mrf.mxu3  ;;  %1611 = vadd.xlane.f32.xlu2 %v1610_v18  ;;  %1479 = vst [vmem:[#allocation9 + $0x1c] sm:$0xff] %v1473_v19 }
 0x137   :  { %v1392_v28 = vadd.f32 %v1391_v24, %v1377_v20  ;;  %1498 = vmax.xlane.f32.xlu0 %v1497_v21 }
 0x139   :  { %v2755_v29 = vadd.f32 %v1392_v28, %v711_v27  ;;  %v1508_v28 = vld [vmem:[#allocation4] sm:$0xff] }
 0x13b   :  { %v1474_v31 = vpack.c.bf16 %v2755_v29, %v2755_v29  ;;  %v1502_v25 = vmax.f32 %v1500_v30, %v2755_v29  ;;  %v1606_v56 = vsel %vm1596_vm11, %v2755_v29, 0.0 }
 0x13c   :  { %v2765_v33 = vadd.f32 %v1615_v26, %v1606_v56  ;;  %v1578_v56 = vld [vmem:[#allocation5 + $0x8] sm:$0xff] }
 0x13d   :  { %1480 = vst [vmem:[#allocation9 + $0x24] sm:$0xf] %v1474_v31  ;;  %v1503_v63 = vmax.f32 %v1502_v25, %v1501_v32  ;;  %v1509_v25 = vld [vmem:[#allocation4 + $0x8] sm:$0xff] }
 0x13e   :  { %1660 = dma.vmem_to_hbm [thread:$0]  %s1653_s21, 640, %s1655_s19, [#allocation8], %s2584_s23, %s2584_s23, %s2585_s24  }
 0x13f   :  { %1504 = vmax.xlane.f32.xlu0 %v1503_v63 }
 0x1a9   :  { %v1612_v36 = vpop.xlane.xlu2 %1611 }
 0x1aa   :  { %v1619_v37 = vadd.f32 %v1612_v36, %v1577_v34  ;;  %v1499_v38 = vpop.xlane.xlu0 %1498 }
 0x1ab   :  { %v2772_v39 = vmax.f32 %v2769_v35, %v1499_v38 }
 0x1ac   :  { %1621 = vst.msk [vmem:[#allocation5] sm:$0xff] %vm1485_vm3, %v1619_v37 }
 0x1ad   :  { %v1510_v40 = vsub.f32 %v2769_v35, %v2772_v39  ;;  %1575 = vst.msk [vmem:[#allocation3] sm:$0xff] %vm1485_vm3, %v2772_v39  ;;  %1520 = vperm.xlu1 %2498, %v2772_v39  }
 0x1af   :  { %v1512_v24 = vmul.f32 1.442695, %v1510_v40 }
 0x1b2   :  { %v1505_v42 = vpop.xlane.xlu0 %1504 }
 0x1b3   :  { %v2783_v43 = vmax.f32 %v2780_v41, %v1505_v42  ;;  %v1636_v42 = vld [vmem:[#allocation5] sm:$0xff] }
 0x1b4   :  { %v1626_v40 = vld [vmem:[#allocation3] sm:$0xff] }
 0x1b5   :  { %v1511_v44 = vsub.f32 %v2780_v41, %v2783_v43  ;;  %1576 = vst.msk [vmem:[#allocation3 + $0x8] sm:$0xff] %vm1485_vm3, %v2783_v43  ;;  %1525 = vperm.xlu1 %2498, %v2783_v43   ;;  %v2529_v43 = vld [vmem:[%s2833_s3] sm:$0xff] }
 0x1b6   :  { %vm1642_vm12 = vcmp.lt.s32.totalorder %v2529_v43, 0 }
 0x1b7   :  { %v1514_v26 = vmul.f32 1.442695, %v1511_v44 }
 0x21f   :  { %v1521_v45 = vpop.permute.xlu1 %1520 }
 0x220   :  { %v1528_v46 = vsub.f32 %v2684_v58, %v1521_v45  ;;  %v1529_v47 = vsub.f32 %v2686_v61, %v1521_v45  ;;  %v1530_v48 = vsub.f32 %v2724_v51, %v1521_v45  ;;  %v1531_v49 = vsub.f32 %v2726_v52, %v1521_v45 }
 0x221   :  { %v1532_v54 = vsub.f32 %v2734_v9, %v1521_v45 }
 0x222   :  { %v1538_v50 = vmul.f32 1.442695, %v1528_v46  ;;  %v1540_v53 = vmul.f32 1.442695, %v1529_v47  ;;  %v1542_v55 = vmul.f32 1.442695, %v1530_v48 }
 0x223   :  { %v1544_v57 = vmul.f32 1.442695, %v1531_v49  ;;  %v1546_v60 = vmul.f32 1.442695, %v1532_v54  ;;  %v1627_v48 = vld [vmem:[#allocation3 + $0x8] sm:$0xff] }
 0x224   :  { %2501 = vpow2.f32 %v1538_v50  ;;  %v2530_v50 = vld [vmem:[%s2833_s3 + $0x8] sm:$0xff] }
 0x225   :  { %2503 = vpow2.f32 %v1540_v53  ;;  %vm1643_vm13 = vcmp.lt.s32.totalorder %v2530_v50, 0 }
 0x226   :  { %2505 = vpow2.f32 %v1542_v55 }
 0x227   :  { %v1526_v59 = vpop.permute.xlu1 %1525  ;;  %2507 = vpow2.f32 %v1544_v57 }
 0x228   :  { %v1533_v62 = vsub.f32 %v2690_v2, %v1526_v59  ;;  %v1534_v58 = vsub.f32 %v2692_v4, %v1526_v59  ;;  %v1535_v61 = vsub.f32 %v2705_v22, %v1526_v59  ;;  %v1536_v51 = vsub.f32 %v2744_v16, %v1526_v59 }
 0x229   :  { %v1537_v5 = vsub.f32 %v2755_v29, %v1526_v59  ;;  %2509 = vpow2.f32 %v1546_v60 }
 0x22a   :  { %v2502_v52 = vpop.eup %2501  ;;  %v1548_v0 = vmul.f32 1.442695, %v1533_v62  ;;  %v1550_v1 = vmul.f32 1.442695, %v1534_v58  ;;  %v1552_v8 = vmul.f32 1.442695, %v1535_v61 }
 0x22b   :  { %v2504_v3 = vpop.eup %2503  ;;  %v1554_v2 = vmul.f32 1.442695, %v1536_v51  ;;  %v1556_v22 = vmul.f32 1.442695, %v1537_v5 }
 0x22c   :  { %2511 = vpow2.f32 %v1548_v0  ;;  %v1558_v7 = vadd.f32 %v2504_v3, %v2502_v52  ;;  %v2506_v9 = vpop.eup %2505 }
 0x22d   :  { %2513 = vpow2.f32 %v1550_v1  ;;  %v2508_v4 = vpop.eup %2507 }
 0x22e   :  { %v1559_v10 = vadd.f32 %v2506_v9, %v1558_v7  ;;  %2515 = vpow2.f32 %v1552_v8 }
 0x22f   :  { %v2510_v12 = vpop.eup %2509  ;;  %2517 = vpow2.f32 %v1554_v2 }
 0x230   :  { %v1560_v11 = vadd.f32 %v2508_v4, %v1559_v10  ;;  %2519 = vpow2.f32 %v1556_v22 }
 0x231   :  { %2521 = vpow2.f32 %v1512_v24 }
 0x232   :  { %v2512_v14 = vpop.eup %2511  ;;  %v1561_v15 = vadd.f32 %v2510_v12, %v1560_v11  ;;  %2523 = vpow2.f32 %v1514_v26 }
 0x233   :  { %v2514_v16 = vpop.eup %2513 }
 0x234   :  { %1562 = vadd.xlane.f32.xlu0 %v1561_v15  ;;  %v1564_v6 = vadd.f32 %v2514_v16, %v2512_v14  ;;  %v2516_v17 = vpop.eup %2515 }
 0x235   :  { %v2518_v19 = vpop.eup %2517 }
 0x236   :  { %v1565_v18 = vadd.f32 %v2516_v17, %v1564_v6  ;;  %v2520_v21 = vpop.eup %2519 }
 0x237   :  { %v2522_v27 = vpop.eup %2521 }
 0x238   :  { %v1566_v20 = vadd.f32 %v2518_v19, %v1565_v18  ;;  %v1516_v29 = vmul.f32 %v2522_v27, %v1508_v28  ;;  %v2524_v32 = vpop.eup %2523 }
 0x23a   :  { %v1567_v23 = vadd.f32 %v2520_v21, %v1566_v20 }
 0x23c   :  { %1617 = vadd.xlane.f32.xlu0 %v2765_v33  ;;  %1568 = vadd.xlane.f32.xlu1 %v1567_v23  ;;  %v1517_v33 = vmul.f32 %v2524_v32, %v1509_v25 }
 0x2a7   :  { %v1563_v30 = vpop.xlane.xlu0 %1562 }
 0x2a8   :  { %v1570_v31 = vadd.f32 %v1563_v30, %v1516_v29 }
 0x2aa   :  { %1573 = vst.msk [vmem:[#allocation4] sm:$0xff] %vm1485_vm3, %v1570_v31 }
 0x2af   :  { %v1569_v63 = vpop.xlane.xlu1 %1568  ;;  %v1618_v13 = vpop.xlane.xlu0 %1617 }
 0x2b0   :  { %v1571_v34 = vadd.f32 %v1569_v63, %v1517_v33  ;;  %v1620_v35 = vadd.f32 %v1618_v13, %v1578_v56 }
 0x2b1   :  { %v1628_v36 = vld [vmem:[#allocation4] sm:$0xff] }
 0x2b2   :  { %2525 = vlog2.f32 %v1628_v36  ;;  %1574 = vst.msk [vmem:[#allocation4 + $0x8] sm:$0xff] %vm1485_vm3, %v1571_v34 }
 0x2b3   :  { %1622 = vst.msk [vmem:[#allocation5 + $0x8] sm:$0xff] %vm1485_vm3, %v1620_v35 }
 0x2b8   :  { %v2526_v37 = vpop.eup %2525 }
 0x2b9   :  { %v1631_v38 = vmul.f32 0.6931472, %v2526_v37  ;;  %v1629_v39 = vld [vmem:[#allocation4 + $0x8] sm:$0xff] }
 0x2ba   :  { %2527 = vlog2.f32 %v1629_v39  ;;  %v1637_v53 = vld [vmem:[#allocation5 + $0x8] sm:$0xff] }
 0x2bb   :  { %v1634_v41 = vadd.f32 %v1631_v38, %v1626_v40 }
 0x2bd   :  { %v1638_v44 = vsub.f32 %v1634_v41, %v1636_v42 }
 0x2bf   :  { %v1644_v45 = vsel %vm1642_vm12, 0.0, %v1638_v44 }
 0x2c0   :  { %v2528_v46 = vpop.eup %2527  ;;  %1646 = vst.msk [vmem:[%s2835_s5] sm:$0xff] %vm1485_vm3, %v1644_v45 }
 0x2c1   :  { %v1633_v47 = vmul.f32 0.6931472, %v2528_v46 }
 0x2c3   :  { %v1635_v49 = vadd.f32 %v1633_v47, %v1627_v48 }
 0x2c5   :  { %v1639_v54 = vsub.f32 %v1635_v49, %v1637_v53 }
 0x2c7   :  { %v1645_v55 = vsel %vm1643_vm13, 0.0, %v1639_v54 }
 0x2c8   :  { %1647 = vst.msk [vmem:[%s2835_s5 + $0x8] sm:$0xff] %vm1485_vm3, %v1645_v55 }
 0x2c9   :  { %2581 = dma.done.wait [#allocation8], 640  }
 0x2ca   :  { %2582 = vsyncadd [#allocation8], 4294966656 }
 0x2cb   :  { %1669 = vsyncpa [#allocation7], 1 }
 0x2cc   :  { %1670 = vsyncpa [#allocation8], 1 }

</bundles_post_ra>
